<compile_context>
chip_gen: v7x
topology: tpu7x:2x2x1
jax: 0.10.0
libtpu: 0.0.40
codegen_flags: <defaults>
</compile_context>

<pallas_src>
import functools

import jax
import jax.numpy as jnp
from jax.experimental import pallas as pl
from jax.experimental.pallas import tpu as pltpu

# ----------------------------- model hyper-parameters ------------------------------
STATE_DIM = 24          # 2x2x2 cube: 24 stickers
ONE_HOT_DEPTH = 6       # 6 colors
H1_DIM = 128
RESNET_DIM = 128
NUM_RESNET_BLOCKS = 2
OUT_DIM = 1
IN_DIM = STATE_DIM * ONE_HOT_DEPTH  # 144

MIN_BATCH_TILE = 256    # multiple of 128 (v5e MXU rows) and 256 (v6e/v7x)
MAX_BATCH_TILE = 4096   # ~2.3 MiB int32 input tile; total VMEM use well under 32 MiB


def _choose_batch_tile(batch_size: int) -> int:
    """Largest multiple of 256 that (a) keeps >=2 grid steps for B >= 512 (v7x megacore)
    and (b) is capped at 4096 rows so VMEM stays comfortable on v7x (64 MiB physical)."""
    half = max(batch_size // 2, MIN_BATCH_TILE)
    tile = (half // MIN_BATCH_TILE) * MIN_BATCH_TILE
    return max(MIN_BATCH_TILE, min(tile, MAX_BATCH_TILE))


# ------------------------------------ kernel ---------------------------------------
def resnet_kernel(srep_ref, color_ref,
                  w1_ref, b1_ref, w2_ref, b2_ref,
                  wa_ref, ba_ref, wb_ref, bb_ref,
                  wout_ref, bout_ref, o_ref, *, num_blocks):
    # ---- in-kernel one-hot (VPU integer compare; matches F.one_hot(...).view(-1, S*D)) ----
    # srep_ref: (TB, 144) int32 where srep[b, j] = states[b, j // 6]
    # color_ref: (1, 144) int32 where color[0, j] = j % 6
    x = jnp.where(srep_ref[...] == color_ref[...],
                  jnp.float32(1.0), jnp.float32(0.0)).astype(jnp.bfloat16)   # (TB, 144)

    # ---- fc1 + relu (bf16 MXU inputs, f32 accumulate / elementwise) ----
    h = jnp.dot(x, w1_ref[...], preferred_element_type=jnp.float32) + b1_ref[...]
    h = jnp.maximum(h, 0.0)

    # ---- fc2 + relu ----
    h = jnp.dot(h.astype(jnp.bfloat16), w2_ref[...],
                preferred_element_type=jnp.float32) + b2_ref[...]
    h = jnp.maximum(h, 0.0)

    # ---- residual blocks (static Python loop; block weights stacked on leading axis) ----
    for blk in range(num_blocks):
        res_inp = h
        t = jnp.dot(h.astype(jnp.bfloat16), wa_ref[blk],
                    preferred_element_type=jnp.float32) + ba_ref[blk]
        t = jnp.maximum(t, 0.0)
        t = jnp.dot(t.astype(jnp.bfloat16), wb_ref[blk],
                    preferred_element_type=jnp.float32) + bb_ref[blk]
        h = jnp.maximum(t + res_inp, 0.0)

    # ---- fc_out: out_dim == 1 -> VPU multiply + lane reduce instead of an N=1 matmul ----
    out = jnp.sum(h * wout_ref[...], axis=-1, keepdims=True) + bout_ref[...]
    o_ref[...] = out.astype(o_ref.dtype)


# ----------------------------------- wrapper ----------------------------------------
def resnet_forward_pallas(states, params, *, batch_tile=None):
    """states: (B, STATE_DIM) int32 cube states in [0, ONE_HOT_DEPTH);
    params: f32 master parameters from init_params()."""
    (w1, b1, w2, b2, wa, ba, wb, bb, wout_row, bout) = params
    nb = wa.shape[0]

    B = states.shape[0]
    if batch_tile is None:
        batch_tile = _choose_batch_tile(B)
    assert batch_tile % MIN_BATCH_TILE == 0, "batch_tile must be a multiple of 256"

    B_pad = ((B + batch_tile - 1) // batch_tile) * batch_tile

    # pre-replicate each sticker value 6x along lanes (wrapper-side, off the MXU):
    #   srep[b, j] = states[b, j // 6]
    srep = jnp.repeat(states.astype(jnp.int32), ONE_HOT_DEPTH, axis=1)      # (B, 144)
    if B_pad != B:
        # zero padding rows produce valid (color-0) one-hots; they are sliced off below
        srep = jnp.pad(srep, ((0, B_pad - B), (0, 0)))

    # color[0, j] = j % 6  (int32, compared against srep inside the kernel)
    color = jnp.tile(jnp.arange(ONE_HOT_DEPTH, dtype=jnp.int32),
                     STATE_DIM).reshape(1, IN_DIM)                          # (1, 144)

    # bf16 copies only for the MXU operands; biases / fc_out stay f32
    w1b = w1.astype(jnp.bfloat16)
    w2b = w2.astype(jnp.bfloat16)
    wab = wa.astype(jnp.bfloat16)
    wbb = wb.astype(jnp.bfloat16)

    grid = (B_pad // batch_tile,)

    batch_map = lambda i: (i, 0)
    const2 = lambda i: (0, 0)
    const3 = lambda i: (0, 0, 0)

    kernel = functools.partial(resnet_kernel, num_blocks=nb)

    # advisory cost estimate for the XLA scheduler
    flops_per_row = 2 * (IN_DIM * H1_DIM                      # fc1
                         + H1_DIM * RESNET_DIM                # fc2
                         + nb * 2 * RESNET_DIM * RESNET_DIM   # residual blocks
                         + RESNET_DIM)                        # fc_out reduce
    weight_args = (color, w1b, b1, w2b, b2, wab, ba, wbb, bb, wout_row, bout)
    param_bytes = sum(int(p.size) * p.dtype.itemsize for p in weight_args)
    cost = pl.CostEstimate(
        flops=flops_per_row * B_pad,
        transcendentals=0,
        bytes_accessed=B_pad * IN_DIM * 4 + B_pad * OUT_DIM * 4 + param_bytes)

    out = pl.pallas_call(
        kernel,
        out_shape=jax.ShapeDtypeStruct((B_pad, OUT_DIM), jnp.float32),
        grid_spec=pltpu.PrefetchScalarGridSpec(
            num_scalar_prefetch=0,
            grid=grid,
            in_specs=[
                pl.BlockSpec((batch_tile, IN_DIM), batch_map),       # replicated int32 states
                pl.BlockSpec((1, IN_DIM), const2),                   # color pattern (j % 6)
                pl.BlockSpec((IN_DIM, H1_DIM), const2),              # w1 (bf16)
                pl.BlockSpec((1, H1_DIM), const2),                   # b1 (f32)
                pl.BlockSpec((H1_DIM, RESNET_DIM), const2),          # w2 (bf16)
                pl.BlockSpec((1, RESNET_DIM), const2),               # b2 (f32)
                pl.BlockSpec((nb, RESNET_DIM, RESNET_DIM), const3),  # block fc1 weights (bf16)
                pl.BlockSpec((nb, 1, RESNET_DIM), const3),           # block fc1 biases
                pl.BlockSpec((nb, RESNET_DIM, RESNET_DIM), const3),  # block fc2 weights (bf16)
                pl.BlockSpec((nb, 1, RESNET_DIM), const3),           # block fc2 biases
                pl.BlockSpec((1, RESNET_DIM), const2),               # w_out as (1, R) row (f32)
                pl.BlockSpec((1, OUT_DIM), const2),                  # b_out
            ],
            out_specs=pl.BlockSpec((batch_tile, OUT_DIM), batch_map),
        ),
        compiler_params=pltpu.CompilerParams(
            dimension_semantics=("parallel",),        # shard grid across v7x TensorCores
            vmem_limit_bytes=32 * 1024 * 1024,
        ),
        cost_estimate=cost,
    )(srep, color, w1b, b1, w2b, b2, wab, ba, wbb, bb, wout_row, bout)

    return out[:B]


# ---------------------------- deterministic parameter init ---------------------------
def init_params(key):
    """Master parameters kept in f32 (PyTorch nn.Linear default-init layout, stored (in, out));
    the wrapper makes bf16 copies of the matmul weights for the MXU."""
    keys = jax.random.split(key, 8)

    def lin(k, fan_in, fan_out):
        bound = 1.0 / jnp.sqrt(fan_in)
        kw, kb = jax.random.split(k)
        w = jax.random.uniform(kw, (fan_in, fan_out), jnp.float32, -bound, bound)
        b = jax.random.uniform(kb, (1, fan_out), jnp.float32, -bound, bound)
        return w, b

    w1, b1 = lin(keys[0], IN_DIM, H1_DIM)
    w2, b2 = lin(keys[1], H1_DIM, RESNET_DIM)

    was, bas, wbs, bbs = [], [], [], []
    for i in range(NUM_RESNET_BLOCKS):
        wa_i, ba_i = lin(keys[2 + 2 * i], RESNET_DIM, RESNET_DIM)
        wb_i, bb_i = lin(keys[3 + 2 * i], RESNET_DIM, RESNET_DIM)
        was.append(wa_i); bas.append(ba_i)
        wbs.append(wb_i); bbs.append(bb_i)
    wa = jnp.stack(was, axis=0)          # (NB, R, R)
    ba = jnp.stack(bas, axis=0)          # (NB, 1, R)
    wb = jnp.stack(wbs, axis=0)
    bb = jnp.stack(bbs, axis=0)

    wout, bout = lin(keys[2 + 2 * NUM_RESNET_BLOCKS], RESNET_DIM, OUT_DIM)
    wout_row = wout.T                    # (1, RESNET_DIM) for the VPU-reduce fc_out

    return (w1, b1, w2, b2, wa, ba, wb, bb, wout_row, bout)


# ------------------------------ pure-JAX references -----------------------------------
def _onehot(states):
    x = jax.nn.one_hot(states, ONE_HOT_DEPTH, dtype=jnp.float32)
    return x.reshape(states.shape[0], IN_DIM)


def resnet_forward_ref_bf16(states, params):
    """Matches the kernel numerics (bf16 MXU inputs/weights, f32 accumulation)."""
    (w1, b1, w2, b2, wa, ba, wb, bb, wout_row, bout) = params

    def mm(a, w):
        return jnp.dot(a.astype(jnp.bfloat16), w.astype(jnp.bfloat16),
                       preferred_element_type=jnp.float32)

    h = jnp.maximum(mm(_onehot(states), w1) + b1, 0.0)
    h = jnp.maximum(mm(h, w2) + b2, 0.0)
    for blk in range(wa.shape[0]):
        res = h
        t = jnp.maximum(mm(h, wa[blk]) + ba[blk], 0.0)
        t = mm(t, wb[blk]) + bb[blk]
        h = jnp.maximum(t + res, 0.0)
    return jnp.sum(h * wout_row, axis=-1, keepdims=True) + bout


def resnet_forward_ref_f32(states, params):
    """Original PyTorch-module semantics: all math in f32 with the master f32 weights."""
    (w1, b1, w2, b2, wa, ba, wb, bb, wout_row, bout) = params
    h = jnp.maximum(_onehot(states) @ w1 + b1, 0.0)
    h = jnp.maximum(h @ w2 + b2, 0.0)
    for blk in range(wa.shape[0]):
        res = h
        t = jnp.maximum(h @ wa[blk] + ba[blk], 0.0)
        t = t @ wb[blk] + bb[blk]
        h = jnp.maximum(t + res, 0.0)
    return jnp.sum(h * wout_row, axis=-1, keepdims=True) + bout


# -------------------------------------- main -----------------------------------------
if __name__ == "__main__":
    key = jax.random.PRNGKey(0)
    k_params, k_states = jax.random.split(key)

    params = init_params(k_params)

    # integer cube states: (B, STATE_DIM) with values in [0, ONE_HOT_DEPTH)
    B = 500  # not a multiple of the auto-chosen tile -> exercises padding + 2-step grid
    states = jax.random.randint(k_states, (B, STATE_DIM), 0, ONE_HOT_DEPTH,
                                dtype=jnp.int32)

    out = resnet_forward_pallas(states, params)
    out = jax.block_until_ready(out)
    assert out.shape == (B, OUT_DIM)

    ref_bf16 = resnet_forward_ref_bf16(states, params)
    ref_f32 = resnet_forward_ref_f32(states, params)
    assert jnp.allclose(out, ref_bf16, atol=1e-2, rtol=1e-2), "mismatch vs bf16-matched reference"
    assert jnp.allclose(out, ref_f32, atol=5e-2, rtol=5e-2), "mismatch vs f32 (PyTorch-semantics) reference"

    print("KERNEL_OK")
</pallas_src>

<mosaic_0001>
module attributes {stable_mosaic.version = 11 : i64} {
  func.func @resnet_kernel(%arg0: i32, %arg1: memref<256x144xi32, #tpu.memory_space<vmem>>, %arg2: memref<1x144xi32, #tpu.memory_space<vmem>>, %arg3: memref<144x128xbf16, #tpu.memory_space<vmem>>, %arg4: memref<1x128xf32, #tpu.memory_space<vmem>>, %arg5: memref<128x128xbf16, #tpu.memory_space<vmem>>, %arg6: memref<1x128xf32, #tpu.memory_space<vmem>>, %arg7: memref<2x128x128xbf16, #tpu.memory_space<vmem>>, %arg8: memref<2x1x128xf32, #tpu.memory_space<vmem>>, %arg9: memref<2x128x128xbf16, #tpu.memory_space<vmem>>, %arg10: memref<2x1x128xf32, #tpu.memory_space<vmem>>, %arg11: memref<1x128xf32, #tpu.memory_space<vmem>>, %arg12: memref<1x1xf32, #tpu.memory_space<vmem>>, %arg13: memref<256x1xf32, #tpu.memory_space<vmem>>) attributes {dimension_semantics = [#tpu.dimension_semantics<parallel>], iteration_bounds = array<i64: 2>, scalar_prefetch = 0 : i64, scratch_operands = 0 : i64, tpu.core_type = #tpu.core_type<tc>, window_params = [{transform_indices = @transform_0, window_bounds = array<i64: 256, 144>}, {pipeline_mode = #tpu.pipeline_mode<synchronous>, transform_indices = @transform_1, window_bounds = array<i64: 1, 144>}, {pipeline_mode = #tpu.pipeline_mode<synchronous>, transform_indices = @transform_2, window_bounds = array<i64: 144, 128>}, {pipeline_mode = #tpu.pipeline_mode<synchronous>, transform_indices = @transform_3, window_bounds = array<i64: 1, 128>}, {pipeline_mode = #tpu.pipeline_mode<synchronous>, transform_indices = @transform_4, window_bounds = array<i64: 128, 128>}, {pipeline_mode = #tpu.pipeline_mode<synchronous>, transform_indices = @transform_5, window_bounds = array<i64: 1, 128>}, {pipeline_mode = #tpu.pipeline_mode<synchronous>, transform_indices = @transform_6, window_bounds = array<i64: 2, 128, 128>}, {pipeline_mode = #tpu.pipeline_mode<synchronous>, transform_indices = @transform_7, window_bounds = array<i64: 2, 1, 128>}, {pipeline_mode = #tpu.pipeline_mode<synchronous>, transform_indices = @transform_8, window_bounds = array<i64: 2, 128, 128>}, {pipeline_mode = #tpu.pipeline_mode<synchronous>, transform_indices = @transform_9, window_bounds = array<i64: 2, 1, 128>}, {pipeline_mode = #tpu.pipeline_mode<synchronous>, transform_indices = @transform_10, window_bounds = array<i64: 1, 128>}, {pipeline_mode = #tpu.pipeline_mode<synchronous>, transform_indices = @transform_11, window_bounds = array<i64: 1, 1>}, {transform_indices = @transform_12, window_bounds = array<i64: 256, 1>}]} {
    %c0 = arith.constant 0 : index
    %c0_0 = arith.constant 0 : index
    %0 = vector.load %arg1[%c0, %c0_0] : memref<256x144xi32, #tpu.memory_space<vmem>>, vector<256x144xi32>
    %c0_1 = arith.constant 0 : index
    %c0_2 = arith.constant 0 : index
    %1 = vector.load %arg2[%c0_1, %c0_2] : memref<1x144xi32, #tpu.memory_space<vmem>>, vector<1x144xi32>
    %2 = vector.broadcast %1 : vector<1x144xi32> to vector<256x144xi32>
    %3 = arith.cmpi eq, %0, %2 : vector<256x144xi32>
    %cst = arith.constant 1.000000e+00 : f32
    %cst_3 = arith.constant 0.000000e+00 : f32
    %4 = vector.broadcast %cst : f32 to vector<256x144xf32>
    %5 = vector.broadcast %cst_3 : f32 to vector<256x144xf32>
    %6 = arith.select %3, %4, %5 : vector<256x144xi1>, vector<256x144xf32>
    %7 = arith.truncf %6 : vector<256x144xf32> to vector<256x144xbf16>
    %c0_4 = arith.constant 0 : index
    %c0_5 = arith.constant 0 : index
    %8 = vector.load %arg3[%c0_4, %c0_5] : memref<144x128xbf16, #tpu.memory_space<vmem>>, vector<144x128xbf16>
    %cst_6 = arith.constant dense<0.000000e+00> : vector<256x128xf32>
    %9 = tpu.matmul %7, %8, %cst_6 {dimension_numbers = #tpu.dot_dimension_numbers<[1], [0], [0], [1], [0, 0, 1, 1], [], []>} : vector<256x144xbf16>, vector<144x128xbf16>, vector<256x128xf32> -> vector<256x128xf32>
    %c0_7 = arith.constant 0 : index
    %c0_8 = arith.constant 0 : index
    %10 = vector.load %arg4[%c0_7, %c0_8] : memref<1x128xf32, #tpu.memory_space<vmem>>, vector<1x128xf32>
    %11 = vector.broadcast %10 : vector<1x128xf32> to vector<256x128xf32>
    %12 = arith.addf %9, %11 : vector<256x128xf32>
    %cst_9 = arith.constant 0.000000e+00 : f32
    %13 = vector.broadcast %cst_9 : f32 to vector<256x128xf32>
    %14 = arith.maximumf %12, %13 : vector<256x128xf32>
    %15 = arith.truncf %14 : vector<256x128xf32> to vector<256x128xbf16>
    %c0_10 = arith.constant 0 : index
    %c0_11 = arith.constant 0 : index
    %16 = vector.load %arg5[%c0_10, %c0_11] : memref<128x128xbf16, #tpu.memory_space<vmem>>, vector<128x128xbf16>
    %cst_12 = arith.constant dense<0.000000e+00> : vector<256x128xf32>
    %17 = tpu.matmul %15, %16, %cst_12 {dimension_numbers = #tpu.dot_dimension_numbers<[1], [0], [0], [1], [0, 0, 1, 1], [], []>} : vector<256x128xbf16>, vector<128x128xbf16>, vector<256x128xf32> -> vector<256x128xf32>
    %c0_13 = arith.constant 0 : index
    %c0_14 = arith.constant 0 : index
    %18 = vector.load %arg6[%c0_13, %c0_14] : memref<1x128xf32, #tpu.memory_space<vmem>>, vector<1x128xf32>
    %19 = vector.broadcast %18 : vector<1x128xf32> to vector<256x128xf32>
    %20 = arith.addf %17, %19 : vector<256x128xf32>
    %cst_15 = arith.constant 0.000000e+00 : f32
    %21 = vector.broadcast %cst_15 : f32 to vector<256x128xf32>
    %22 = arith.maximumf %20, %21 : vector<256x128xf32>
    %23 = arith.truncf %22 : vector<256x128xf32> to vector<256x128xbf16>
    %c0_16 = arith.constant 0 : index
    %c0_17 = arith.constant 0 : index
    %c0_18 = arith.constant 0 : index
    %24 = vector.load %arg7[%c0_16, %c0_17, %c0_18] : memref<2x128x128xbf16, #tpu.memory_space<vmem>>, vector<1x128x128xbf16>
    %25 = vector.shape_cast %24 : vector<1x128x128xbf16> to vector<128x128xbf16>
    %cst_19 = arith.constant dense<0.000000e+00> : vector<256x128xf32>
    %26 = tpu.matmul %23, %25, %cst_19 {dimension_numbers = #tpu.dot_dimension_numbers<[1], [0], [0], [1], [0, 0, 1, 1], [], []>} : vector<256x128xbf16>, vector<128x128xbf16>, vector<256x128xf32> -> vector<256x128xf32>
    %c0_20 = arith.constant 0 : index
    %c0_21 = arith.constant 0 : index
    %c0_22 = arith.constant 0 : index
    %27 = vector.load %arg8[%c0_20, %c0_21, %c0_22] : memref<2x1x128xf32, #tpu.memory_space<vmem>>, vector<1x1x128xf32>
    %28 = vector.shape_cast %27 : vector<1x1x128xf32> to vector<1x128xf32>
    %29 = vector.broadcast %28 : vector<1x128xf32> to vector<256x128xf32>
    %30 = arith.addf %26, %29 : vector<256x128xf32>
    %cst_23 = arith.constant 0.000000e+00 : f32
    %31 = vector.broadcast %cst_23 : f32 to vector<256x128xf32>
    %32 = arith.maximumf %30, %31 : vector<256x128xf32>
    %33 = arith.truncf %32 : vector<256x128xf32> to vector<256x128xbf16>
    %c0_24 = arith.constant 0 : index
    %c0_25 = arith.constant 0 : index
    %c0_26 = arith.constant 0 : index
    %34 = vector.load %arg9[%c0_24, %c0_25, %c0_26] : memref<2x128x128xbf16, #tpu.memory_space<vmem>>, vector<1x128x128xbf16>
    %35 = vector.shape_cast %34 : vector<1x128x128xbf16> to vector<128x128xbf16>
    %cst_27 = arith.constant dense<0.000000e+00> : vector<256x128xf32>
    %36 = tpu.matmul %33, %35, %cst_27 {dimension_numbers = #tpu.dot_dimension_numbers<[1], [0], [0], [1], [0, 0, 1, 1], [], []>} : vector<256x128xbf16>, vector<128x128xbf16>, vector<256x128xf32> -> vector<256x128xf32>
    %c0_28 = arith.constant 0 : index
    %c0_29 = arith.constant 0 : index
    %c0_30 = arith.constant 0 : index
    %37 = vector.load %arg10[%c0_28, %c0_29, %c0_30] : memref<2x1x128xf32, #tpu.memory_space<vmem>>, vector<1x1x128xf32>
    %38 = vector.shape_cast %37 : vector<1x1x128xf32> to vector<1x128xf32>
    %39 = vector.broadcast %38 : vector<1x128xf32> to vector<256x128xf32>
    %40 = arith.addf %36, %39 : vector<256x128xf32>
    %41 = arith.addf %40, %22 : vector<256x128xf32>
    %cst_31 = arith.constant 0.000000e+00 : f32
    %42 = vector.broadcast %cst_31 : f32 to vector<256x128xf32>
    %43 = arith.maximumf %41, %42 : vector<256x128xf32>
    %44 = arith.truncf %43 : vector<256x128xf32> to vector<256x128xbf16>
    %c1 = arith.constant 1 : index
    %c0_32 = arith.constant 0 : index
    %c0_33 = arith.constant 0 : index
    %45 = vector.load %arg7[%c1, %c0_32, %c0_33] : memref<2x128x128xbf16, #tpu.memory_space<vmem>>, vector<1x128x128xbf16>
    %46 = vector.shape_cast %45 : vector<1x128x128xbf16> to vector<128x128xbf16>
    %cst_34 = arith.constant dense<0.000000e+00> : vector<256x128xf32>
    %47 = tpu.matmul %44, %46, %cst_34 {dimension_numbers = #tpu.dot_dimension_numbers<[1], [0], [0], [1], [0, 0, 1, 1], [], []>} : vector<256x128xbf16>, vector<128x128xbf16>, vector<256x128xf32> -> vector<256x128xf32>
    %c1_35 = arith.constant 1 : index
    %c0_36 = arith.constant 0 : index
    %c0_37 = arith.constant 0 : index
    %48 = vector.load %arg8[%c1_35, %c0_36, %c0_37] : memref<2x1x128xf32, #tpu.memory_space<vmem>>, vector<1x1x128xf32>
    %49 = vector.shape_cast %48 : vector<1x1x128xf32> to vector<1x128xf32>
    %50 = vector.broadcast %49 : vector<1x128xf32> to vector<256x128xf32>
    %51 = arith.addf %47, %50 : vector<256x128xf32>
    %cst_38 = arith.constant 0.000000e+00 : f32
    %52 = vector.broadcast %cst_38 : f32 to vector<256x128xf32>
    %53 = arith.maximumf %51, %52 : vector<256x128xf32>
    %54 = arith.truncf %53 : vector<256x128xf32> to vector<256x128xbf16>
    %c1_39 = arith.constant 1 : index
    %c0_40 = arith.constant 0 : index
    %c0_41 = arith.constant 0 : index
    %55 = vector.load %arg9[%c1_39, %c0_40, %c0_41] : memref<2x128x128xbf16, #tpu.memory_space<vmem>>, vector<1x128x128xbf16>
    %56 = vector.shape_cast %55 : vector<1x128x128xbf16> to vector<128x128xbf16>
    %cst_42 = arith.constant dense<0.000000e+00> : vector<256x128xf32>
    %57 = tpu.matmul %54, %56, %cst_42 {dimension_numbers = #tpu.dot_dimension_numbers<[1], [0], [0], [1], [0, 0, 1, 1], [], []>} : vector<256x128xbf16>, vector<128x128xbf16>, vector<256x128xf32> -> vector<256x128xf32>
    %c1_43 = arith.constant 1 : index
    %c0_44 = arith.constant 0 : index
    %c0_45 = arith.constant 0 : index
    %58 = vector.load %arg10[%c1_43, %c0_44, %c0_45] : memref<2x1x128xf32, #tpu.memory_space<vmem>>, vector<1x1x128xf32>
    %59 = vector.shape_cast %58 : vector<1x1x128xf32> to vector<1x128xf32>
    %60 = vector.broadcast %59 : vector<1x128xf32> to vector<256x128xf32>
    %61 = arith.addf %57, %60 : vector<256x128xf32>
    %62 = arith.addf %61, %43 : vector<256x128xf32>
    %cst_46 = arith.constant 0.000000e+00 : f32
    %63 = vector.broadcast %cst_46 : f32 to vector<256x128xf32>
    %64 = arith.maximumf %62, %63 : vector<256x128xf32>
    %c0_47 = arith.constant 0 : index
    %c0_48 = arith.constant 0 : index
    %65 = vector.load %arg11[%c0_47, %c0_48] : memref<1x128xf32, #tpu.memory_space<vmem>>, vector<1x128xf32>
    %66 = vector.broadcast %65 : vector<1x128xf32> to vector<256x128xf32>
    %67 = arith.mulf %64, %66 : vector<256x128xf32>
    %cst_49 = arith.constant dense<0.000000e+00> : vector<256xf32>
    %68 = vector.multi_reduction <add>, %67, %cst_49 [1] : vector<256x128xf32> to vector<256xf32>
    %69 = vector.shape_cast %68 : vector<256xf32> to vector<256x1xf32>
    %c0_50 = arith.constant 0 : index
    %c0_51 = arith.constant 0 : index
    %70 = vector.load %arg12[%c0_50, %c0_51] : memref<1x1xf32, #tpu.memory_space<vmem>>, vector<1x1xf32>
    %71 = vector.broadcast %70 : vector<1x1xf32> to vector<256x1xf32>
    %72 = arith.addf %69, %71 : vector<256x1xf32>
    %c0_52 = arith.constant 0 : index
    %c0_53 = arith.constant 0 : index
    %73 = vector.load %arg13[%c0_52, %c0_53] : memref<256x1xf32, #tpu.memory_space<vmem>>, vector<256x1xf32>
    tpu.vector_store %arg13[%c0_52, %c0_53], %72 {strides = array<i32>} : memref<256x1xf32, #tpu.memory_space<vmem>>, vector<256x1xf32>,
    return
  }
  func.func @transform_0(%arg0: i32) -> (i32, i32) {
    %c0_i32 = arith.constant 0 : i32
    %c0_i32_0 = arith.constant 0 : i32
    return %arg0, %c0_i32 : i32, i32
  }
  func.func @transform_1(%arg0: i32) -> (i32, i32) {
    %c0_i32 = arith.constant 0 : i32
    %c0_i32_0 = arith.constant 0 : i32
    %c0_i32_1 = arith.constant 0 : i32
    return %c0_i32, %c0_i32_0 : i32, i32
  }
  func.func @transform_2(%arg0: i32) -> (i32, i32) {
    %c0_i32 = arith.constant 0 : i32
    %c0_i32_0 = arith.constant 0 : i32
    %c0_i32_1 = arith.constant 0 : i32
    return %c0_i32, %c0_i32_0 : i32, i32
  }
  func.func @transform_3(%arg0: i32) -> (i32, i32) {
    %c0_i32 = arith.constant 0 : i32
    %c0_i32_0 = arith.constant 0 : i32
    %c0_i32_1 = arith.constant 0 : i32
    return %c0_i32, %c0_i32_0 : i32, i32
  }
  func.func @transform_4(%arg0: i32) -> (i32, i32) {
    %c0_i32 = arith.constant 0 : i32
    %c0_i32_0 = arith.constant 0 : i32
    %c0_i32_1 = arith.constant 0 : i32
    return %c0_i32, %c0_i32_0 : i32, i32
  }
  func.func @transform_5(%arg0: i32) -> (i32, i32) {
    %c0_i32 = arith.constant 0 : i32
    %c0_i32_0 = arith.constant 0 : i32
    %c0_i32_1 = arith.constant 0 : i32
    return %c0_i32, %c0_i32_0 : i32, i32
  }
  func.func @transform_6(%arg0: i32) -> (i32, i32, i32) {
    %c0_i32 = arith.constant 0 : i32
    %c0_i32_0 = arith.constant 0 : i32
    %c0_i32_1 = arith.constant 0 : i32
    %c0_i32_2 = arith.constant 0 : i32
    return %c0_i32, %c0_i32_0, %c0_i32_1 : i32, i32, i32
  }
  func.func @transform_7(%arg0: i32) -> (i32, i32, i32) {
    %c0_i32 = arith.constant 0 : i32
    %c0_i32_0 = arith.constant 0 : i32
    %c0_i32_1 = arith.constant 0 : i32
    %c0_i32_2 = arith.constant 0 : i32
    return %c0_i32, %c0_i32_0, %c0_i32_1 : i32, i32, i32
  }
  func.func @transform_8(%arg0: i32) -> (i32, i32, i32) {
    %c0_i32 = arith.constant 0 : i32
    %c0_i32_0 = arith.constant 0 : i32
    %c0_i32_1 = arith.constant 0 : i32
    %c0_i32_2 = arith.constant 0 : i32
    return %c0_i32, %c0_i32_0, %c0_i32_1 : i32, i32, i32
  }
  func.func @transform_9(%arg0: i32) -> (i32, i32, i32) {
    %c0_i32 = arith.constant 0 : i32
    %c0_i32_0 = arith.constant 0 : i32
    %c0_i32_1 = arith.constant 0 : i32
    %c0_i32_2 = arith.constant 0 : i32
    return %c0_i32, %c0_i32_0, %c0_i32_1 : i32, i32, i32
  }
  func.func @transform_10(%arg0: i32) -> (i32, i32) {
    %c0_i32 = arith.constant 0 : i32
    %c0_i32_0 = arith.constant 0 : i32
    %c0_i32_1 = arith.constant 0 : i32
    return %c0_i32, %c0_i32_0 : i32, i32
  }
  func.func @transform_11(%arg0: i32) -> (i32, i32) {
    %c0_i32 = arith.constant 0 : i32
    %c0_i32_0 = arith.constant 0 : i32
    %c0_i32_1 = arith.constant 0 : i32
    return %c0_i32, %c0_i32_0 : i32, i32
  }
  func.func @transform_12(%arg0: i32) -> (i32, i32) {
    %c0_i32 = arith.constant 0 : i32
    %c0_i32_0 = arith.constant 0 : i32
    return %arg0, %c0_i32 : i32, i32
  }
}

</mosaic_0001>

<bundles_post_ra>
// kernel: tpu_custom_call.1
= control target key start
LH: loop header
LB: loop body
LE: loop exit
PB: predicated region body
PF: predicated region fallthrough
CT: control target
= control target key end

     0   :  { %s3343_s23 = smov 0   ;;  %s4760_s0 = inlined_call_operand.vmem [shape: s32[512,144], index: 0, kind: input, shape index: {}]   ;;  %s4761_s1 = inlined_call_operand.vmem [shape: s32[1,144], index: 1, kind: input, shape index: {}]   ;;  %s4762_s2 = inlined_call_operand.vmem [shape: bf16[144,128], index: 2, kind: input, shape index: {}]   ;;  %s4763_s3 = inlined_call_operand.vmem [shape: f32[1,128], index: 3, kind: input, shape index: {}]   ;;  %s4764_s4 = inlined_call_operand.vmem [shape: bf16[128,128], index: 4, kind: input, shape index: {}]   ;;  %s4765_s5 = inlined_call_operand.vmem [shape: f32[1,128], index: 5, kind: input, shape index: {}]   ;;  %s4766_s6 = inlined_call_operand.vmem [shape: bf16[2,128,128], index: 6, kind: input, shape index: {}]   ;;  %s4767_s7 = inlined_call_operand.vmem [shape: f32[2,1,128], index: 7, kind: input, shape index: {}]   ;;  %s4768_s8 = inlined_call_operand.vmem [shape: bf16[2,128,128], index: 8, kind: input, shape index: {}]   ;;  %s4769_s9 = inlined_call_operand.vmem [shape: f32[2,1,128], index: 9, kind: input, shape index: {}]   ;;  %s4770_s10 = inlined_call_operand.vmem [shape: f32[1,128], index: 10, kind: input, shape index: {}]   ;;  %s4771_s11 = inlined_call_operand.<no memory space> [shape: f32[1,1], index: 11, kind: input, shape index: {}]   ;;  %s4772_s12 = inlined_call_operand.vmem [shape: f32[512,1], index: 12, kind: output, shape index: {}]  }
   0x1   :  { %v17_v0 = vstv %s4771_s11 }
   0x2   :  { %18 = vst [vmem:[#allocation2] sm:$0x1] %v17_v0 }
   0x3 LB: > { %s2676_s24 = sadd.s32 4294967295, %s3270_s23   ;;  %p2680_p0 = scmp.ge.s32.totalorder %s3270_s23, 1  ;;  %s3270_s23 = sphi %s3343_s23, %s24_s23  }
   0x4   : > { %p366_p1 = scmp.lt.s32.totalorder %s3270_s23, 3 }
   0x6   : > { %p367_p2 = pnand %p2680_p0, %p366_p1 }
   0x7   : > { %v3215_v1 = vld [vmem:[%s4762_s2] sm:$0xff] (!%p367_p2)   ;;  %v488_v2 = vlaneseq (!%p367_p2)  ;;  %v3272_v3 = vmov (!%p367_p2), 0   ;;  %s2681_s11 = sshll.u32 (!%p367_p2), %s2676_s24, 5  ;;  %v3216_v4 = vld [vmem:[%s4762_s2 + $0x8] sm:$0xff] (!%p367_p2)   ;;  %v3217_v6 = vld [vmem:[%s4762_s2 + $0x10] sm:$0xff] (!%p367_p2)   ;;  %v3273_v13 = vmov (!%p367_p2), 0.0  }
   0x8   : > { %370 = sbr.rel (%p367_p2) target bundleno = 1646 (0x66e), region = 68  ;;  %784 = vmatprep.subr.bf16.mxu0 (!%p367_p2), %v3272_v3  ;;  %p410_p3 = scmp.lt.s32.totalorder (!%p367_p2), %s2681_s11, 63  ;;  %v487_v10 = vld [vmem:[%s4761_s1] sm:$0x3] (!%p367_p2)  ;;  %v3218_v11 = vld [vmem:[%s4762_s2 + $0x18] sm:$0xff] (!%p367_p2)   ;;  %vm735_vm2 = vcmask (!%p367_p2), 130048  }
   0x9   : > { %785 = vmatpush1.bf16.msra.mxu0 (!%p367_p2), %v3215_v1  ;;  %v489_v5 = vshrl.u32 (!%p367_p2), %v488_v2, 7  ;;  %v3219_v16 = vld [vmem:[%s4762_s2 + $0x20] sm:$0xff] (!%p367_p2)   ;;  %v3220_v22 = vld [vmem:[%s4762_s2 + $0x28] sm:$0xff] (!%p367_p2)   ;;  %v3221_v33 = vld [vmem:[%s4762_s2 + $0x30] sm:$0xff] (!%p367_p2)  }
   0xa   : > { %786 = vmatprep.subr.bf16.mxu0 (!%p367_p2), %v3272_v3  ;;  %v3222_v43 = vld [vmem:[%s4762_s2 + $0x38] sm:$0xff] (!%p367_p2)  }
   0xb   : > { %v494_v7 = vsub.s32 (!%p367_p2), 1, %v489_v5  ;;  %v490_v20 = vsub.s32 (!%p367_p2), 0, %v489_v5 }
   0xd   : > { %787 = vmatpush1.bf16.msra.mxu0 (!%p367_p2), %v3216_v4  ;;  %v3379_v12 = vrot.slane (!%p367_p2), %v487_v10, %v494_v7  ;;  %v3402_v25 = vrot.slane (!%p367_p2), %v487_v10, %v490_v20  ;;  %v3223_v7 = vld [vmem:[%s4762_s2 + $0x40] sm:$0xff] (!%p367_p2)  }
   0xe   : > { %788 = vmatprep.subr.bf16.mxu0 (!%p367_p2), %v3272_v3 }
   0xf   : > { %s4879_s11 = smov (!%p410_p3, %s2681_s11), 63 }
  0x10   : > { %s2827_s13 = sshll.u32 %s4879_s11, 4  ;;  %s2685_s24 = sshll.u32 %s4879_s11, 3 }
  0x11   : > { %s3369_s16 = scalar_lea.vmem %s4760_s0, %s2827_s13  ;;  %789 = vmatpush1.bf16.msra.mxu0 %v3217_v6  ;;  %s4659_s27 = scalar_lea.vmem %s4772_s12, %s2685_s24 }
  0x12   : > { %v424_v8 = vld [vmem:[%s3369_s16 + $0x8] sm:$0xff]  ;;  %v426_v9 = vld [vmem:[%s3369_s16 + $0x18] sm:$0xff]  ;;  %790 = vmatprep.subr.bf16.mxu0 %v3272_v3  ;;  %v423_v27 = vld [vmem:[%s3369_s16] sm:$0xff] }
  0x13   : > { %vm497_vm0 = vcmp.eq.s32.totalorder %v424_v8, %v3379_v12  ;;  %vm499_vm1 = vcmp.eq.s32.totalorder %v426_v9, %v3379_v12  ;;  %v428_v18 = vld [vmem:[%s3369_s16 + $0x28] sm:$0xff]  ;;  %v430_v19 = vld [vmem:[%s3369_s16 + $0x38] sm:$0xff]  ;;  %v425_v28 = vld [vmem:[%s3369_s16 + $0x10] sm:$0xff]  ;;  %vm496_vm9 = vcmp.eq.s32.totalorder %v423_v27, %v3402_v25 }
  0x14   : > { %v561_v14 = vsel %vm497_vm0, 1.0, %v3273_v13  ;;  %v563_v15 = vsel %vm499_vm1, 1.0, %v3273_v13  ;;  %vm501_vm3 = vcmp.eq.s32.totalorder %v428_v18, %v3379_v12  ;;  %vm503_vm4 = vcmp.eq.s32.totalorder %v430_v19, %v3379_v12  ;;  %v432_v21 = vld [vmem:[%s3369_s16 + $0x48] sm:$0xff]  ;;  %v434_v23 = vld [vmem:[%s3369_s16 + $0x58] sm:$0xff]  ;;  %v3429_v36 = vld [vmem:[%s3369_s16 + $0x20] sm:$0xff] }
  0x15   : > { %791 = vmatpush1.bf16.msra.mxu0 %v3218_v11  ;;  %v625_v17 = vpack.c.bf16 %v563_v15, %v561_v14  ;;  %v436_v24 = vld [vmem:[%s3369_s16 + $0x68] sm:$0xff]  ;;  %v438_v26 = vld [vmem:[%s3369_s16 + $0x78] sm:$0xff]  ;;  %v3408_v29 = vsel %vm501_vm3, 1.0, %v3273_v13  ;;  %v3411_v30 = vsel %vm503_vm4, 1.0, %v3273_v13  ;;  %vm505_vm5 = vcmp.eq.s32.totalorder %v432_v21, %v3379_v12  ;;  %v3432_v37 = vld [vmem:[%s3369_s16 + $0x30] sm:$0xff] }
  0x16   : > { %792 = vmatprep.subr.bf16.mxu0 %v3272_v3  ;;  %vm507_vm6 = vcmp.eq.s32.totalorder %v434_v23, %v3379_v12  ;;  %vm509_vm7 = vcmp.eq.s32.totalorder %v436_v24, %v3379_v12  ;;  %v452_v31 = vld [vmem:[%s3369_s16 + $0xe8] sm:$0xff]  ;;  %v454_v32 = vld [vmem:[%s3369_s16 + $0xf8] sm:$0xff]  ;;  %vm511_vm8 = vcmp.eq.s32.totalorder %v438_v26, %v3379_v12  ;;  %vm498_vm10 = vcmp.eq.s32.totalorder %v425_v28, %v3402_v25  ;;  %v455_v41 = vld [vmem:[%s3369_s16 + $0x100] sm:$0xff] }
  0x17   : > { %2696 = vmatprep.mubr.msk.bf16.mxu0 %vm735_vm2, %v625_v17  ;;  %v456_v34 = vld [vmem:[%s3369_s16 + $0x108] sm:$0xff]  ;;  %v627_v35 = vpack.c.bf16 %v3411_v30, %v3408_v29  ;;  %v3435_v38 = vsel %vm505_vm5, 1.0, %v3273_v13  ;;  %v458_v40 = vld [vmem:[%s3369_s16 + $0x118] sm:$0xff]  ;;  %v457_v42 = vld [vmem:[%s3369_s16 + $0x110] sm:$0xff]  ;;  %v3449_v44 = vsel %vm507_vm6, 1.0, %v3273_v13  ;;  %v3454_v45 = vsel %vm509_vm7, 1.0, %v3273_v13 }
  0x18   : > { %v3438_v39 = vld [vmem:[%s3369_s16 + $0x88] sm:$0xff]  ;;  %v3457_v46 = vld [vmem:[%s3369_s16 + $0x98] sm:$0xff]  ;;  %vm525_vm11 = vcmp.eq.s32.totalorder %v452_v31, %v3379_v12  ;;  %vm527_vm12 = vcmp.eq.s32.totalorder %v454_v32, %v3379_v12  ;;  %v459_v51 = vld [vmem:[%s3369_s16 + $0x120] sm:$0xff]  ;;  %v3473_v52 = vsel %vm511_vm8, 1.0, %v3273_v13  ;;  %vm529_vm13 = vcmp.eq.s32.totalorder %v456_v34, %v3379_v12 }
  0x19   : > { %793 = vmatpush1.bf16.msra.mxu0 %v3219_v16  ;;  %v3460_v47 = vld [vmem:[%s3369_s16 + $0xa8] sm:$0xff]  ;;  %v3463_v48 = vld [vmem:[%s3369_s16 + $0xb8] sm:$0xff]  ;;  %v3476_v53 = vsel %vm525_vm11, 1.0, %v3273_v13  ;;  %v3479_v54 = vsel %vm527_vm12, 1.0, %v3273_v13  ;;  %v461_v55 = vld [vmem:[%s3369_s16 + $0x130] sm:$0xff]  ;;  %vm531_vm15 = vcmp.eq.s32.totalorder %v458_v40, %v3379_v12  ;;  %v3503_v62 = vsel %vm529_vm13, 1.0, %v3273_v13 }
  0x1a   : > { %794 = vmatprep.subr.bf16.mxu0 %v3272_v3  ;;  %v460_v49 = vld [vmem:[%s3369_s16 + $0x128] sm:$0xff]  ;;  %v462_v50 = vld [vmem:[%s3369_s16 + $0x138] sm:$0xff]  ;;  %vm3489_vm14 = vmpackc.low %vm498_vm10, %vm496_vm9  ;;  %v639_v61 = vpack.c.bf16 %v3479_v54, %v3476_v53  ;;  %vm528_vm0 = vcmp.eq.s32.totalorder %v455_v41, %v3402_v25  ;;  %v3511_v2 = vsel %vm531_vm15, 1.0, %v3273_v13  ;;  %vm530_vm1 = vcmp.eq.s32.totalorder %v457_v42, %v3402_v25 }
  0x1b   : > { %v464_v56 = vld [vmem:[%s3369_s16 + $0x148] sm:$0xff]  ;;  %v466_v57 = vld [vmem:[%s3369_s16 + $0x158] sm:$0xff]  ;;  %v3494_v59 = vld [vmem:[%s3369_s16 + $0x40] sm:$0xff]  ;;  %vm533_vm3 = vcmp.eq.s32.totalorder %v460_v49, %v3379_v12  ;;  %vm535_vm4 = vcmp.eq.s32.totalorder %v462_v50, %v3379_v12  ;;  %vm500_vm5 = vcmp.eq.s32.totalorder %v3429_v36, %v3402_v25  ;;  %vm502_vm6 = vcmp.eq.s32.totalorder %v3432_v37, %v3402_v25 }
  0x1c   : > { %v3497_v60 = vld [vmem:[%s3369_s16 + $0x50] sm:$0xff]  ;;  %v463_v63 = vld [vmem:[%s3369_s16 + $0x140] sm:$0xff]  ;;  %v468_v1 = vld [vmem:[%s3369_s16 + $0x168] sm:$0xff]  ;;  %v641_v8 = vpack.c.bf16 %v3511_v2, %v3503_v62  ;;  %v3537_v10 = vsel %vm533_vm3, 1.0, %v3273_v13  ;;  %v3540_v11 = vsel %vm535_vm4, 1.0, %v3273_v13  ;;  %vm532_vm9 = vcmp.eq.s32.totalorder %v459_v51, %v3402_v25 }
  0x1d   : > { %795 = vmatpush1.bf16.msra.mxu0 %v3220_v22  ;;  %v465_v0 = vld [vmem:[%s3369_s16 + $0x150] sm:$0xff]  ;;  %v470_v4 = vld [vmem:[%s3369_s16 + $0x178] sm:$0xff]  ;;  %v467_v5 = vld [vmem:[%s3369_s16 + $0x160] sm:$0xff]  ;;  %v643_v16 = vpack.c.bf16 %v3540_v11, %v3537_v10  ;;  %vm534_vm13 = vcmp.eq.s32.totalorder %v461_v55, %v3402_v25  ;;  %vm537_vm15 = vcmp.eq.s32.totalorder %v464_v56, %v3379_v12  ;;  %vm536_vm3 = vcmp.eq.s32.totalorder %v463_v63, %v3402_v25 }
  0x1e   : > { %796 = vmatprep.subr.bf16.mxu0 %v3272_v3  ;;  %v469_v6 = vld [vmem:[%s3369_s16 + $0x170] sm:$0xff]  ;;  %vm3532_vm8 = vmpackc.low %vm530_vm1, %vm528_vm0  ;;  %v472_v14 = vld [vmem:[%s3369_s16 + $0x188] sm:$0xff]  ;;  %vm539_vm0 = vcmp.eq.s32.totalorder %v466_v57, %v3379_v12  ;;  %v3564_v21 = vsel %vm537_vm15, 1.0, %v3273_v13  ;;  %vm538_vm4 = vcmp.eq.s32.totalorder %v465_v0, %v3402_v25  ;;  %vm543_vm12 = vcmp.eq.s32.totalorder %v470_v4, %v3379_v12 }
  0x1f   : > { %v474_v15 = vld [vmem:[%s3369_s16 + $0x198] sm:$0xff]  ;;  %v471_v17 = vld [vmem:[%s3369_s16 + $0x180] sm:$0xff]  ;;  %v473_v18 = vld [vmem:[%s3369_s16 + $0x190] sm:$0xff]  ;;  %v3567_v22 = vsel %vm539_vm0, 1.0, %v3273_v13  ;;  %vm541_vm0 = vcmp.eq.s32.totalorder %v468_v1, %v3379_v12  ;;  %vm540_vm11 = vcmp.eq.s32.totalorder %v467_v5, %v3402_v25  ;;  %v3593_v32 = vsel %vm543_vm12, 1.0, %v3273_v13 }
  0x20   : > { %v476_v19 = vld [vmem:[%s3369_s16 + $0x1a8] sm:$0xff]  ;;  %vm3559_vm1 = vmpackc.low %vm534_vm13, %vm532_vm9  ;;  %v478_v23 = vld [vmem:[%s3369_s16 + $0x1b8] sm:$0xff]  ;;  %v645_v26 = vpack.c.bf16 %v3567_v22, %v3564_v21  ;;  %v3590_v31 = vsel %vm541_vm0, 1.0, %v3273_v13  ;;  %vm547_vm0 = vcmp.eq.s32.totalorder %v474_v15, %v3379_v12  ;;  %vm544_vm12 = vcmp.eq.s32.totalorder %v471_v17, %v3402_v25 }
  0x21   : > { %797 = vmatpush1.bf16.msra.mxu0 %v3221_v33  ;;  %v475_v24 = vld [vmem:[%s3369_s16 + $0x1a0] sm:$0xff]  ;;  %vm3580_vm15 = vmpackc.low %vm538_vm4, %vm536_vm3  ;;  %v480_v28 = vld [vmem:[%s3369_s16 + $0x1c8] sm:$0xff]  ;;  %vm542_vm3 = vcmp.eq.s32.totalorder %v469_v6, %v3402_v25  ;;  %vm545_vm4 = vcmp.eq.s32.totalorder %v472_v14, %v3379_v12  ;;  %v647_v41 = vpack.c.bf16 %v3593_v32, %v3590_v31  ;;  %v3614_v51 = vsel %vm547_vm0, 1.0, %v3273_v13 }
  0x22   : > { %798 = vmatprep.subr.bf16.mxu0 %v3272_v3  ;;  %v482_v33 = vld [vmem:[%s3369_s16 + $0x1d8] sm:$0xff]  ;;  %v479_v34 = vld [vmem:[%s3369_s16 + $0x1c0] sm:$0xff]  ;;  %v481_v40 = vld [vmem:[%s3369_s16 + $0x1d0] sm:$0xff]  ;;  %vm546_vm9 = vcmp.eq.s32.totalorder %v473_v18, %v3402_v25  ;;  %vm548_vm0 = vcmp.eq.s32.totalorder %v475_v24, %v3402_v25  ;;  %v4833_v24 = vmov 0 }
  0x23   : > { %vm3602_vm13 = vmpackc.low %vm542_vm3, %vm540_vm11  ;;  %v484_v49 = vld [vmem:[%s3369_s16 + $0x1e8] sm:$0xff]  ;;  %v486_v50 = vld [vmem:[%s3369_s16 + $0x1f8] sm:$0xff]  ;;  %vm549_vm11 = vcmp.eq.s32.totalorder %v476_v19, %v3379_v12  ;;  %vm551_vm3 = vcmp.eq.s32.totalorder %v478_v23, %v3379_v12  ;;  %vm555_vm10 = vcmp.eq.s32.totalorder %v482_v33, %v3379_v12  ;;  %vm554_vm7 = vcmp.eq.s32.totalorder %v481_v40, %v3402_v25 }
  0x24   : > { %v483_v55 = vld [vmem:[%s3369_s16 + $0x1e0] sm:$0xff]  ;;  %v485_v56 = vld [vmem:[%s3369_s16 + $0x1f0] sm:$0xff]  ;;  %v3628_v0 = vsel %vm549_vm11, 1.0, %v3273_v13  ;;  %v3631_v1 = vsel %vm551_vm3, 1.0, %v3273_v13  ;;  %v3225_v6 = vld [vmem:[%s4764_s4 + $0x8] sm:$0xff]   ;;  %v3656_v17 = vsel %vm555_vm10, 1.0, %v3273_v13  ;;  %vm552_vm3 = vcmp.eq.s32.totalorder %v479_v34, %v3402_v25 }
  0x25   : > { %799 = vmatpush1.bf16.msra.mxu0 %v3222_v43  ;;  %v3608_v43 = vsel %vm545_vm4, 1.0, %v3273_v13  ;;  %vm3623_vm4 = vmpackc.low %vm546_vm9, %vm544_vm12  ;;  %v3224_v4 = vld [vmem:[%s4764_s4] sm:$0xff]   ;;  %v651_v5 = vpack.c.bf16 %v3631_v1, %v3628_v0  ;;  %vm553_vm12 = vcmp.eq.s32.totalorder %v480_v28, %v3379_v12  ;;  %vm557_vm10 = vcmp.eq.s32.totalorder %v484_v49, %v3379_v12  ;;  %v437_v28 = vld [vmem:[%s3369_s16 + $0x70] sm:$0xff] }
  0x26   : > { %800 = vmatprep.subr.bf16.mxu0 %v3272_v3  ;;  %v477_v3 = vld [vmem:[%s3369_s16 + $0x1b0] sm:$0xff]  ;;  %v649_v57 = vpack.c.bf16 %v3614_v51, %v3608_v43  ;;  %v3653_v15 = vsel %vm553_vm12, 1.0, %v3273_v13  ;;  %vm3679_vm12 = vmpackc.low %vm502_vm6, %vm500_vm5  ;;  %3188 = vmatprep.subr.bf16.mxu1 %v3224_v4  ;;  %vm4830_vm5 = vcmp.eq.s32.totalorder %v3457_v46, %v3379_v12  ;;  %vm4831_vm6 = vcmp.eq.s32.totalorder %v3460_v47, %v3379_v12  ;;  %v3227_v33 = vld [vmem:[%s4764_s4 + $0x18] sm:$0xff]  }
  0x27   : > { %vm550_vm9 = vcmp.eq.s32.totalorder %v477_v3, %v3402_v25  ;;  %v653_v58 = vpack.c.bf16 %v3656_v17, %v3653_v15  ;;  %v579_v36 = vsel %vm4830_vm5, 1.0, %v3273_v13  ;;  %v581_v37 = vsel %vm4831_vm6, 1.0, %v3273_v13  ;;  %v3226_v46 = vld [vmem:[%s4764_s4 + $0x10] sm:$0xff]   ;;  %3196 = vmatpush3.bf16.msra.mxu1 %v3224_v4  ;;  %v435_v3 = vld [vmem:[%s3369_s16 + $0x60] sm:$0xff]  ;;  %v3231_v54 = vld [vmem:[%s4764_s4 + $0x38] sm:$0xff]  }
  0x28   : > { %vm3648_vm11 = vmpackc.low %vm550_vm9, %vm548_vm0  ;;  %vm559_vm0 = vcmp.eq.s32.totalorder %v486_v50, %v3379_v12  ;;  %vm556_vm9 = vcmp.eq.s32.totalorder %v483_v55, %v3402_v25  ;;  %3189 = vmatprep.subr.bf16.mxu1 %v3225_v6  ;;  %v629_v47 = vpack.c.bf16 %v3449_v44, %v3435_v38  ;;  %vm4836_vm5 = vcmp.eq.s32.totalorder %v3497_v60, %v3402_v25  ;;  %v441_v60 = vld [vmem:[%s3369_s16 + $0x90] sm:$0xff]  ;;  %v443_v40 = vld [vmem:[%s3369_s16 + $0xa0] sm:$0xff] }
  0x29   : > { %801 = vmatpush1.bf16.msra.mxu0 %v3223_v7  ;;  %v3274_v7 = vmov 1.0|1.0   ;;  %v3691_v19 = vsel %vm559_vm0, 1.0, %v3273_v13  ;;  %vm510_vm6 = vcmp.eq.s32.totalorder %v437_v28, %v3402_v25  ;;  %v631_v38 = vpack.c.bf16 %v3473_v52, %v3454_v45  ;;  %v448_v45 = vld [vmem:[%s3369_s16 + $0xc8] sm:$0xff]  ;;  %v450_v52 = vld [vmem:[%s3369_s16 + $0xd8] sm:$0xff]  ;;  %v445_v49 = vld [vmem:[%s3369_s16 + $0xb0] sm:$0xff] }
  0x2a   : > { %2948 = vmatprep.subr.bf16.mxu0 %v3224_v4  ;;  %v453_v29 = vld [vmem:[%s3369_s16 + $0xf0] sm:$0xff]  ;;  %v3855_v9 = vld [vmem:[%s4766_s6] sm:$0xff]  }
  0x2b   : > { %3197 = vmatpush3.bf16.msra.mxu1 %v3225_v6  ;;  %v3230_v53 = vld [vmem:[%s4764_s4 + $0x30] sm:$0xff]  }
  0x2c   : > { %2698 = vmatmul.mubr.msk.bf16.vlgmr.msra.gmra.mrb[0].mxu0 %vm3489_vm14, %v3274_v7  ;;  %vm3666_vm14 = vmpackc.low %vm554_vm7, %vm552_vm3  ;;  %vm4829_vm7 = vcmp.eq.s32.totalorder %v3438_v39, %v3379_v12  ;;  %vm558_vm3 = vcmp.eq.s32.totalorder %v485_v56, %v3402_v25  ;;  %3190 = vmatprep.subr.bf16.mxu1 %v3226_v46 }
  0x2d   : > { %2699 = vmatprep.mubr.msk.bf16.mxu0 %vm735_vm2, %v627_v35  ;;  %v577_v30 = vsel %vm4829_vm7, 1.0, %v3273_v13  ;;  %v3688_v35 = vsel %vm557_vm10, 1.0, %v3273_v13  ;;  %2949 = vmatpush3.bf16.msra.mxu0 %v3224_v4  ;;  %vm4832_vm10 = vcmp.eq.s32.totalorder %v3463_v48, %v3379_v12  ;;  %vm3708_vm0 = vmpackc.low %vm558_vm3, %vm556_vm9  ;;  %vm4835_vm7 = vcmp.eq.s32.totalorder %v3494_v59, %v3402_v25  ;;  %v439_v59 = vld [vmem:[%s3369_s16 + $0x80] sm:$0xff] }
  0x2e   : > { %v583_v39 = vsel %vm4832_vm10, 1.0, %v3273_v13  ;;  %v655_v23 = vpack.c.bf16 %v3691_v19, %v3688_v35  ;;  %v4834_v24 = vsel %vm3708_vm0, 4294967295, %v4833_v24  ;;  %2950 = vmatprep.subr.bf16.mxu0 %v3225_v6  ;;  %vm3723_vm9 = vmpackc.low %vm4836_vm5, %vm4835_vm7  ;;  %vm508_vm3 = vcmp.eq.s32.totalorder %v435_v3, %v3402_v25  ;;  %v447_v4 = vld [vmem:[%s3369_s16 + $0xc0] sm:$0xff] }
  0x2f   : > { %3198 = vmatpush3.bf16.msra.mxu1 %v3226_v46  ;;  %vm2706_vm10 = vmpackc.low %vm510_vm6, %vm508_vm3  ;;  %v633_v44 = vpack.c.bf16 %v579_v36, %v577_v30  ;;  %vm514_vm7 = vcmp.eq.s32.totalorder %v441_v60, %v3402_v25  ;;  %v635_v34 = vpack.c.bf16 %v583_v39, %v581_v37  ;;  %vm523_vm3 = vcmp.eq.s32.totalorder %v450_v52, %v3379_v12 }
  0x30   : > { %3191 = vmatprep.subr.bf16.mxu1 %v3227_v33  ;;  %vm516_vm6 = vcmp.eq.s32.totalorder %v443_v40, %v3402_v25  ;;  %v587_v55 = vsel %vm523_vm3, 1.0, %v3273_v13  ;;  %vm526_vm3 = vcmp.eq.s32.totalorder %v453_v29, %v3402_v25 }
  0x31   : > { %2951 = vmatpush3.bf16.msra.mxu0 %v3225_v6  ;;  %v449_v6 = vld [vmem:[%s3369_s16 + $0xd0] sm:$0xff] }
  0x32   : > { %2952 = vmatprep.subr.bf16.mxu0 %v3226_v46 }
  0x33   : > { %3199 = vmatpush3.bf16.msra.mxu1 %v3227_v33 }
  0x34   : > { %2701 = vmatmul.mubr.msk.bf16.gmra.mrb[4].mxu0 %vm3679_vm12, %v3274_v7  ;;  %vm512_vm12 = vcmp.eq.s32.totalorder %v439_v59, %v3402_v25 }
  0x35   : > { %2702 = vmatprep.mubr.msk.bf16.mxu0 %vm735_vm2, %v629_v47  ;;  %2953 = vmatpush3.bf16.msra.mxu0 %v3226_v46  ;;  %vm2709_vm5 = vmpackc.low %vm514_vm7, %vm512_vm12  ;;  %vm520_vm7 = vcmp.eq.s32.totalorder %v447_v4, %v3402_v25 }
  0x36   : > { %2954 = vmatprep.subr.bf16.mxu0 %v3227_v33 }
  0x39   : > { %2955 = vmatpush3.bf16.msra.mxu0 %v3227_v33 }
  0x3c   : > { %2704 = vmatmul.mubr.msk.bf16.gmra.mrb[8].mxu0 %vm3723_vm9, %v3274_v7  ;;  %vm521_vm9 = vcmp.eq.s32.totalorder %v448_v45, %v3379_v12  ;;  %v451_v12 = vld [vmem:[%s3369_s16 + $0xe0] sm:$0xff] }
  0x3d   : > { %2705 = vmatprep.mubr.msk.bf16.mxu0 %vm735_vm2, %v631_v38  ;;  %v585_v50 = vsel %vm521_vm9, 1.0, %v3273_v13  ;;  %vm524_vm9 = vcmp.eq.s32.totalorder %v451_v12, %v3402_v25  ;;  %v3228_v13 = vld [vmem:[%s4764_s4 + $0x20] sm:$0xff]  }
  0x3e   : > { %v637_v56 = vpack.c.bf16 %v587_v55, %v585_v50  ;;  %2956 = vmatprep.subr.bf16.mxu0 %v3228_v13  ;;  %3192 = vmatprep.subr.bf16.mxu1 %v3228_v13 }
  0x3f   : > { %2957 = vmatpush3.bf16.msra.mxu0 %v3228_v13  ;;  %3200 = vmatpush3.bf16.msra.mxu1 %v3228_v13 }
  0x44   : > { %2707 = vmatmul.mubr.msk.bf16.gmra.mrb[12].mxu0 %vm2706_vm10, %v3274_v7  ;;  %vm518_vm10 = vcmp.eq.s32.totalorder %v445_v49, %v3402_v25 }
  0x45   : > { %2708 = vmatprep.mubr.msk.bf16.mxu0 %vm735_vm2, %v633_v44  ;;  %vm2712_vm12 = vmpackc.low %vm518_vm10, %vm516_vm6 }
  0x46   : > { %vm2718_vm6 = vmpackc.low %vm526_vm3, %vm524_vm9 }
  0x4c   : > { %2710 = vmatmul.mubr.msk.bf16.gmra.mrb[16].mxu0 %vm2709_vm5, %v3274_v7  ;;  %vm522_vm5 = vcmp.eq.s32.totalorder %v449_v6, %v3402_v25  ;;  %v3229_v25 = vld [vmem:[%s4764_s4 + $0x28] sm:$0xff]  }
  0x4d   : > { %2711 = vmatprep.mubr.msk.bf16.mxu0 %vm735_vm2, %v635_v34  ;;  %vm2715_vm0 = vmpackc.low %vm522_vm5, %vm520_vm7  ;;  %2958 = vmatprep.subr.bf16.mxu0 %v3229_v25 }
  0x4e   : > { %2959 = vmatpush3.bf16.msra.mxu0 %v3229_v25  ;;  %3193 = vmatprep.subr.bf16.mxu1 %v3229_v25 }
  0x4f   : > { %3201 = vmatpush3.bf16.msra.mxu1 %v3229_v25  ;;  %2960 = vmatprep.subr.bf16.mxu0 %v3230_v53 }
  0x50   : > { %3194 = vmatprep.subr.bf16.mxu1 %v3230_v53 }
  0x52   : > { %2961 = vmatpush3.bf16.msra.mxu0 %v3230_v53 }
  0x53   : > { %3202 = vmatpush3.bf16.msra.mxu1 %v3230_v53  ;;  %2962 = vmatprep.subr.bf16.mxu0 %v3231_v54 }
  0x54   : > { %2713 = vmatmul.mubr.msk.bf16.gmra.mrb[20].mxu0 %vm2712_vm12, %v3274_v7  ;;  %3195 = vmatprep.subr.bf16.mxu1 %v3231_v54 }
  0x55   : > { %2714 = vmatprep.mubr.msk.bf16.mxu0 %vm735_vm2, %v637_v56 }
  0x56   : > { %2963 = vmatpush3.bf16.msra.mxu0 %v3231_v54 }
  0x57   : > { %3203 = vmatpush3.bf16.msra.mxu1 %v3231_v54 }
  0x58   : > { %2996 = vmatprep.subr.bf16.mxu1 %v3855_v9 }
  0x5c   : > { %2716 = vmatmul.mubr.msk.bf16.gmra.mrb[24].mxu0 %vm2715_vm0, %v3274_v7 }
  0x5d   : > { %2717 = vmatprep.mubr.msk.bf16.mxu0 %vm735_vm2, %v639_v61  ;;  %v3849_v61 = vld [vmem:[%s4763_s3] ss:$0 sm:$0xff] }
  0x64   : > { %2719 = vmatmul.mubr.msk.bf16.gmra.mrb[28].mxu0 %vm2718_vm6, %v3274_v7 }
  0x65   : > { %2720 = vmatprep.mubr.msk.bf16.mxu0 %vm735_vm2, %v641_v8 }
  0x6c   : > { %2722 = vmatmul.mubr.msk.bf16.gmra.mrb[32].mxu0 %vm3532_vm8, %v3274_v7  ;;  %vm4839_vm8 = vnez %v4834_v24 }
  0x6d   : > { %2723 = vmatprep.mubr.msk.bf16.mxu0 %vm735_vm2, %v643_v16 }
  0x74   : > { %2725 = vmatmul.mubr.msk.bf16.gmra.mrb[36].mxu0 %vm3559_vm1, %v3274_v7 }
  0x75   : > { %2726 = vmatprep.mubr.msk.bf16.mxu0 %vm735_vm2, %v645_v26 }
  0x7c   : > { %2728 = vmatmul.mubr.msk.bf16.gmra.mrb[40].mxu0 %vm3580_vm15, %v3274_v7 }
  0x7d   : > { %2729 = vmatprep.mubr.msk.bf16.mxu0 %vm735_vm2, %v647_v41 }
  0x84   : > { %2731 = vmatmul.mubr.msk.bf16.gmra.mrb[44].mxu0 %vm3602_vm13, %v3274_v7 }
  0x85   : > { %2732 = vmatprep.mubr.msk.bf16.mxu0 %vm735_vm2, %v649_v57 }
  0x8c   : > { %2734 = vmatmul.mubr.msk.bf16.gmra.mrb[48].mxu0 %vm3623_vm4, %v3274_v7 }
  0x8d   : > { %2735 = vmatprep.mubr.msk.bf16.mxu0 %vm735_vm2, %v651_v5 }
  0x94   : > { %2737 = vmatmul.mubr.msk.bf16.gmra.mrb[52].mxu0 %vm3648_vm11, %v3274_v7 }
  0x95   : > { %2738 = vmatprep.mubr.msk.bf16.mxu0 %vm735_vm2, %v653_v58 }
  0x9c   : > { %2740 = vmatmul.mubr.msk.bf16.gmra.mrb[56].mxu0 %vm3666_vm14, %v3274_v7 }
  0x9d   : > { %2741 = vmatprep.mubr.msk.bf16.mxu0 %vm735_vm2, %v655_v23  ;;  %vm2587_vm2 = vcmask 7168  }
  0xa4   : > { %2743 = vmatmul.mubr.msk.bf16.gmra.mrb[60].mxu0 %vm4839_vm8, %v3274_v7 }
  0xff   : > { %v818_v62 = vpop.f32.mrb[0].mxu0 }
 0x100   : > { %v819_v2 = vadd.f32 %v3849_v61, %v818_v62  ;;  %v820_v8 = vpop.f32.mrb[1].mxu0 }
 0x101   : > { %v821_v10 = vpop.f32.mrb[2].mxu0 }
 0x102   : > { %v822_v11 = vadd.f32 %v3849_v61, %v821_v10  ;;  %v823_v16 = vpop.f32.mrb[3].mxu0  ;;  %v945_v20 = vmax.f32 %v819_v2, 0.0 }
 0x104   : > { %v946_v21 = vmax.f32 %v822_v11, 0.0 }
 0x106   : > { %v977_v22 = vpack.c.bf16 %v946_v21, %v945_v20 }
 0x107   : > { %v826_v26 = vpop.f32.mrb[4].mxu0 }
 0x108   : > { %v827_v27 = vadd.f32 %v3849_v61, %v826_v26  ;;  %v828_v31 = vpop.f32.mrb[5].mxu0  ;;  %2964 = vmatprep.mubr.bf16.mxu0 %v977_v22 }
 0x109   : > { %v829_v32 = vpop.f32.mrb[6].mxu0 }
 0x10a   : > { %v830_v41 = vadd.f32 %v3849_v61, %v829_v32  ;;  %v831_v42 = vpop.f32.mrb[7].mxu0  ;;  %v947_v43 = vmax.f32 %v827_v27, 0.0 }
 0x10c   : > { %v948_v51 = vmax.f32 %v830_v41, 0.0 }
 0x10e   : > { %v978_v57 = vpack.c.bf16 %v948_v51, %v947_v43 }
 0x10f   : > { %v834_v63 = vpop.f32.mrb[8].mxu0 }
 0x110   : > { %v835_v0 = vadd.f32 %v3849_v61, %v834_v63  ;;  %v836_v1 = vpop.f32.mrb[9].mxu0  ;;  %2965 = vmatmul.mubr.bf16.vlgmr.msra.gmra.mrb[64].mxu0 %v978_v57 }
 0x111   : > { %v837_v5 = vpop.f32.mrb[10].mxu0 }
 0x112   : > { %v838_v7 = vadd.f32 %v3849_v61, %v837_v5  ;;  %v839_v14 = vpop.f32.mrb[11].mxu0  ;;  %v949_v15 = vmax.f32 %v835_v0, 0.0 }
 0x114   : > { %v950_v17 = vmax.f32 %v838_v7, 0.0 }
 0x116   : > { %v979_v58 = vpack.c.bf16 %v950_v17, %v949_v15 }
 0x117   : > { %v842_v18 = vpop.f32.mrb[12].mxu0 }
 0x118   : > { %v843_v30 = vadd.f32 %v3849_v61, %v842_v18  ;;  %v844_v35 = vpop.f32.mrb[13].mxu0  ;;  %2968 = vmatprep.mubr.bf16.mxu0 %v979_v58 }
 0x119   : > { %v845_v19 = vpop.f32.mrb[14].mxu0 }
 0x11a   : > { %v846_v36 = vadd.f32 %v3849_v61, %v845_v19  ;;  %v847_v37 = vpop.f32.mrb[15].mxu0  ;;  %v951_v39 = vmax.f32 %v843_v30, 0.0  ;;  %v3233_v30 = vld [vmem:[%s4766_s6 + $0x8] sm:$0xff]  }
 0x11c   : > { %v952_v23 = vmax.f32 %v846_v36, 0.0 }
 0x11e   : > { %v980_v24 = vpack.c.bf16 %v952_v23, %v951_v39 }
 0x11f   : > { %v850_v46 = vpop.f32.mrb[16].mxu0 }
 0x120   : > { %v851_v47 = vadd.f32 %v3849_v61, %v850_v46  ;;  %v852_v48 = vpop.f32.mrb[17].mxu0  ;;  %2969 = vmatmul.mubr.bf16.gmra.mrb[68].mxu0 %v980_v24  ;;  %v3234_v24 = vld [vmem:[%s4766_s6 + $0x10] sm:$0xff]  }
 0x121   : > { %v853_v3 = vpop.f32.mrb[18].mxu0 }
 0x122   : > { %v854_v28 = vadd.f32 %v3849_v61, %v853_v3  ;;  %v855_v33 = vpop.f32.mrb[19].mxu0  ;;  %v953_v38 = vmax.f32 %v851_v47, 0.0  ;;  %v3235_v3 = vld [vmem:[%s4766_s6 + $0x18] sm:$0xff]  }
 0x124   : > { %v954_v44 = vmax.f32 %v854_v28, 0.0 }
 0x126   : > { %v981_v59 = vpack.c.bf16 %v954_v44, %v953_v38 }
 0x127   : > { %v858_v60 = vpop.f32.mrb[20].mxu0 }
 0x128   : > { %v859_v45 = vadd.f32 %v3849_v61, %v858_v60  ;;  %v860_v52 = vpop.f32.mrb[21].mxu0  ;;  %2972 = vmatprep.mubr.bf16.mxu0 %v981_v59  ;;  %v3236_v60 = vld [vmem:[%s4766_s6 + $0x20] sm:$0xff]  }
 0x129   : > { %v861_v34 = vpop.f32.mrb[22].mxu0 }
 0x12a   : > { %v862_v40 = vadd.f32 %v3849_v61, %v861_v34  ;;  %v863_v49 = vpop.f32.mrb[23].mxu0  ;;  %v955_v50 = vmax.f32 %v859_v45, 0.0 }
 0x12c   : > { %v956_v55 = vmax.f32 %v862_v40, 0.0  ;;  %v3237_v40 = vld [vmem:[%s4766_s6 + $0x28] sm:$0xff]  }
 0x12e   : > { %v982_v56 = vpack.c.bf16 %v956_v55, %v955_v50 }
 0x12f   : > { %v866_v4 = vpop.f32.mrb[24].mxu0 }
 0x130   : > { %v867_v6 = vadd.f32 %v3849_v61, %v866_v4  ;;  %v868_v12 = vpop.f32.mrb[25].mxu0  ;;  %2973 = vmatmul.mubr.bf16.gmra.mrb[72].mxu0 %v982_v56 }
 0x131   : > { %v869_v29 = vpop.f32.mrb[26].mxu0 }
 0x132   : > { %v870_v13 = vadd.f32 %v3849_v61, %v869_v29  ;;  %v871_v25 = vpop.f32.mrb[27].mxu0  ;;  %v957_v53 = vmax.f32 %v867_v6, 0.0 }
 0x134   : > { %v958_v54 = vmax.f32 %v870_v13, 0.0  ;;  %v3238_v13 = vld [vmem:[%s4766_s6 + $0x30] sm:$0xff]  }
 0x136   : > { %v983_v62 = vpack.c.bf16 %v958_v54, %v957_v53 }
 0x137   : > { %v874_v2 = vpop.f32.mrb[28].mxu0 }
 0x138   : > { %v875_v8 = vadd.f32 %v3849_v61, %v874_v2  ;;  %v876_v10 = vpop.f32.mrb[29].mxu0  ;;  %2976 = vmatprep.mubr.bf16.mxu0 %v983_v62  ;;  %v3239_v2 = vld [vmem:[%s4766_s6 + $0x38] sm:$0xff]  }
 0x139   : > { %v877_v11 = vpop.f32.mrb[30].mxu0 }
 0x13a   : > { %v878_v16 = vadd.f32 %v3849_v61, %v877_v11  ;;  %v879_v20 = vpop.f32.mrb[31].mxu0  ;;  %v959_v21 = vmax.f32 %v875_v8, 0.0 }
 0x13c   : > { %v960_v22 = vmax.f32 %v878_v16, 0.0 }
 0x13e   : > { %v984_v26 = vpack.c.bf16 %v960_v22, %v959_v21 }
 0x13f   : > { %v882_v27 = vpop.f32.mrb[32].mxu0 }
 0x140   : > { %v883_v31 = vadd.f32 %v3849_v61, %v882_v27  ;;  %v884_v32 = vpop.f32.mrb[33].mxu0  ;;  %2977 = vmatmul.mubr.bf16.gmra.mrb[76].mxu0 %v984_v26 }
 0x141   : > { %v885_v41 = vpop.f32.mrb[34].mxu0 }
 0x142   : > { %v886_v42 = vadd.f32 %v3849_v61, %v885_v41  ;;  %v887_v43 = vpop.f32.mrb[35].mxu0  ;;  %v961_v51 = vmax.f32 %v883_v31, 0.0 }
 0x144   : > { %v962_v57 = vmax.f32 %v886_v42, 0.0 }
 0x146   : > { %v985_v63 = vpack.c.bf16 %v962_v57, %v961_v51 }
 0x147   : > { %v890_v0 = vpop.f32.mrb[36].mxu0 }
 0x148   : > { %v891_v1 = vadd.f32 %v3849_v61, %v890_v0  ;;  %v892_v5 = vpop.f32.mrb[37].mxu0  ;;  %2980 = vmatprep.mubr.bf16.mxu1 %v985_v63 }
 0x149   : > { %v893_v7 = vpop.f32.mrb[38].mxu0 }
 0x14a   : > { %v894_v14 = vadd.f32 %v3849_v61, %v893_v7  ;;  %v895_v15 = vpop.f32.mrb[39].mxu0  ;;  %v963_v17 = vmax.f32 %v891_v1, 0.0 }
 0x14c   : > { %v964_v58 = vmax.f32 %v894_v14, 0.0 }
 0x14e   : > { %v986_v18 = vpack.c.bf16 %v964_v58, %v963_v17  ;;  %v3240_v58 = vld [vmem:[%s4768_s8] sm:$0xff]  }
 0x14f   : > { %v898_v35 = vpop.f32.mrb[40].mxu0 }
 0x150   : > { %v899_v19 = vadd.f32 %v3849_v61, %v898_v35  ;;  %v900_v36 = vpop.f32.mrb[41].mxu0  ;;  %2981 = vmatmul.mubr.bf16.vlgmr.msra.gmra.mrb[0].mxu1 %v986_v18  ;;  %v3917_v18 = vld [vmem:[%s4765_s5] ss:$0 sm:$0xff] }
 0x151   : > { %v901_v37 = vpop.f32.mrb[42].mxu0  ;;  %2997 = vmatpush3.bf16.msra.mxu1 %v3855_v9 }
 0x152   : > { %v902_v39 = vadd.f32 %v3849_v61, %v901_v37  ;;  %v903_v23 = vpop.f32.mrb[43].mxu0  ;;  %2998 = vmatprep.subr.bf16.mxu1 %v3233_v30  ;;  %v965_v46 = vmax.f32 %v899_v19, 0.0 }
 0x154   : > { %v966_v47 = vmax.f32 %v902_v39, 0.0 }
 0x155   : > { %2999 = vmatpush3.bf16.msra.mxu1 %v3233_v30 }
 0x156   : > { %v987_v48 = vpack.c.bf16 %v966_v47, %v965_v46  ;;  %3000 = vmatprep.subr.bf16.mxu1 %v3234_v24 }
 0x157   : > { %v906_v28 = vpop.f32.mrb[44].mxu0 }
 0x158   : > { %v907_v9 = vadd.f32 %v3849_v61, %v906_v28  ;;  %v908_v33 = vpop.f32.mrb[45].mxu0  ;;  %2984 = vmatprep.mubr.bf16.mxu1 %v987_v48 }
 0x159   : > { %v909_v38 = vpop.f32.mrb[46].mxu0  ;;  %3001 = vmatpush3.bf16.msra.mxu1 %v3234_v24  ;;  %v3242_v33 = vld [vmem:[%s4768_s8 + $0x10] sm:$0xff]  }
 0x15a   : > { %v910_v44 = vadd.f32 %v3849_v61, %v909_v38  ;;  %v911_v59 = vpop.f32.mrb[47].mxu0  ;;  %3002 = vmatprep.subr.bf16.mxu1 %v3235_v3  ;;  %v967_v45 = vmax.f32 %v907_v9, 0.0  ;;  %v3241_v9 = vld [vmem:[%s4768_s8 + $0x8] sm:$0xff]  }
 0x15b   : > { %v3243_v59 = vld [vmem:[%s4768_s8 + $0x18] sm:$0xff]  }
 0x15c   : > { %v968_v52 = vmax.f32 %v910_v44, 0.0 }
 0x15d   : > { %3003 = vmatpush3.bf16.msra.mxu1 %v3235_v3 }
 0x15e   : > { %v988_v34 = vpack.c.bf16 %v968_v52, %v967_v45  ;;  %3004 = vmatprep.subr.bf16.mxu1 %v3236_v60 }
 0x15f   : > { %v914_v49 = vpop.f32.mrb[48].mxu0 }
 0x160   : > { %v915_v50 = vadd.f32 %v3849_v61, %v914_v49  ;;  %v916_v55 = vpop.f32.mrb[49].mxu0  ;;  %2985 = vmatmul.mubr.bf16.gmra.mrb[4].mxu1 %v988_v34 }
 0x161   : > { %v917_v56 = vpop.f32.mrb[50].mxu0  ;;  %3005 = vmatpush3.bf16.msra.mxu1 %v3236_v60  ;;  %v3244_v55 = vld [vmem:[%s4768_s8 + $0x20] sm:$0xff]  }
 0x162   : > { %v918_v4 = vadd.f32 %v3849_v61, %v917_v56  ;;  %v919_v6 = vpop.f32.mrb[51].mxu0  ;;  %3006 = vmatprep.subr.bf16.mxu1 %v3237_v40  ;;  %v969_v12 = vmax.f32 %v915_v50, 0.0 }
 0x164   : > { %v970_v29 = vmax.f32 %v918_v4, 0.0 }
 0x165   : > { %3007 = vmatpush3.bf16.msra.mxu1 %v3237_v40 }
 0x166   : > { %v989_v25 = vpack.c.bf16 %v970_v29, %v969_v12  ;;  %3008 = vmatprep.subr.bf16.mxu1 %v3238_v13 }
 0x167   : > { %v922_v53 = vpop.f32.mrb[52].mxu0 }
 0x168   : > { %v923_v54 = vadd.f32 %v3849_v61, %v922_v53  ;;  %v924_v62 = vpop.f32.mrb[53].mxu0  ;;  %2988 = vmatprep.mubr.bf16.mxu1 %v989_v25 }
 0x169   : > { %v925_v8 = vpop.f32.mrb[54].mxu0  ;;  %3009 = vmatpush3.bf16.msra.mxu1 %v3238_v13  ;;  %v3245_v13 = vld [vmem:[%s4768_s8 + $0x28] sm:$0xff]  }
 0x16a   : > { %v926_v10 = vadd.f32 %v3849_v61, %v925_v8  ;;  %v927_v11 = vpop.f32.mrb[55].mxu0  ;;  %3010 = vmatprep.subr.bf16.mxu1 %v3239_v2  ;;  %v971_v16 = vmax.f32 %v923_v54, 0.0 }
 0x16c   : > { %v972_v20 = vmax.f32 %v926_v10, 0.0 }
 0x16d   : > { %3011 = vmatpush3.bf16.msra.mxu1 %v3239_v2 }
 0x16e   : > { %v990_v21 = vpack.c.bf16 %v972_v20, %v971_v16  ;;  %3044 = vmatprep.subr.bf16.mxu1 %v3240_v58 }
 0x16f   : > { %v930_v22 = vpop.f32.mrb[56].mxu0 }
 0x170   : > { %v931_v26 = vadd.f32 %v3849_v61, %v930_v22  ;;  %v932_v27 = vpop.f32.mrb[57].mxu0  ;;  %2989 = vmatmul.mubr.bf16.gmra.mrb[8].mxu1 %v990_v21 }
 0x171   : > { %v933_v31 = vpop.f32.mrb[58].mxu0 }
 0x172   : > { %v934_v32 = vadd.f32 %v3849_v61, %v933_v31  ;;  %v935_v41 = vpop.f32.mrb[59].mxu0  ;;  %v973_v42 = vmax.f32 %v931_v26, 0.0 }
 0x174   : > { %v974_v43 = vmax.f32 %v934_v32, 0.0 }
 0x176   : > { %v991_v51 = vpack.c.bf16 %v974_v43, %v973_v42 }
 0x177   : > { %v938_v57 = vpop.f32.mrb[60].mxu0 }
 0x178   : > { %v939_v63 = vadd.f32 %v3849_v61, %v938_v57  ;;  %v940_v0 = vpop.f32.mrb[61].mxu0  ;;  %2992 = vmatprep.mubr.bf16.mxu1 %v991_v51 }
 0x179   : > { %v941_v1 = vpop.f32.mrb[62].mxu0 }
 0x17a   : > { %v942_v5 = vadd.f32 %v3849_v61, %v941_v1  ;;  %v943_v7 = vpop.f32.mrb[63].mxu0  ;;  %v975_v14 = vmax.f32 %v939_v63, 0.0 }
 0x17c   : > { %v976_v15 = vmax.f32 %v942_v5, 0.0 }
 0x17e   : > { %v992_v17 = vpack.c.bf16 %v976_v15, %v975_v14 }
 0x180   : > { %2993 = vmatmul.mubr.bf16.gmra.mrb[12].mxu1 %v992_v17 }
 0x1e3   : > { %v2966_v30 = vpop.f32.mrb[64].mxu0 }
 0x1e4   : > { %v1098_v35 = vpop.f32.mrb[65].mxu0  ;;  %v3923_v36 = vadd.f32 %v2966_v30, %v3917_v18 }
 0x1e5   : > { %v3920_v19 = vadd.f32 %v3917_v18, %v1098_v35  ;;  %v2967_v61 = vpop.f32.mrb[66].mxu0 }
 0x1e6   : > { %v3926_v37 = vadd.f32 %v2967_v61, %v3917_v18  ;;  %v1101_v39 = vpop.f32.mrb[67].mxu0  ;;  %v1227_v48 = vmax.f32 %v3923_v36, 0.0 }
 0x1e7   : > { %v3929_v23 = vadd.f32 %v3917_v18, %v1101_v39  ;;  %v1225_v46 = vmax.f32 %v3920_v19, 0.0 }
 0x1e8   : > { %v1228_v24 = vmax.f32 %v3926_v37, 0.0 }
 0x1e9   : > { %v1226_v47 = vmax.f32 %v3929_v23, 0.0 }
 0x1ea   : > { %v1258_v28 = vpack.c.bf16 %v1228_v24, %v1227_v48 }
 0x1eb   : > { %v1257_v3 = vpack.c.bf16 %v1226_v47, %v1225_v46 }
 0x1ed   : > { %3012 = vmatprep.mubr.bf16.mxu1 %v1257_v3 }
 0x1ee   : > { %3013 = vmatmul.mubr.bf16.vlgmr.msra.gmra.mrb[16].mxu1 %v1258_v28 }
 0x1ef   : > { %3045 = vmatpush3.bf16.msra.mxu1 %v3240_v58 }
 0x1f0   : > { %3046 = vmatprep.subr.bf16.mxu1 %v3241_v9 }
 0x1f3   : > { %v2970_v38 = vpop.f32.mrb[68].mxu0  ;;  %3047 = vmatpush3.bf16.msra.mxu1 %v3241_v9 }
 0x1f4   : > { %v1114_v44 = vpop.f32.mrb[69].mxu0  ;;  %3048 = vmatprep.subr.bf16.mxu1 %v3242_v33  ;;  %v3956_v52 = vadd.f32 %v2970_v38, %v3917_v18 }
 0x1f5   : > { %v3953_v60 = vadd.f32 %v3917_v18, %v1114_v44  ;;  %v2971_v45 = vpop.f32.mrb[70].mxu0 }
 0x1f6   : > { %v3959_v34 = vadd.f32 %v2971_v45, %v3917_v18  ;;  %v1117_v40 = vpop.f32.mrb[71].mxu0  ;;  %v1231_v6 = vmax.f32 %v3956_v52, 0.0 }
 0x1f7   : > { %v3962_v49 = vadd.f32 %v3917_v18, %v1117_v40  ;;  %3049 = vmatpush3.bf16.msra.mxu1 %v3242_v33  ;;  %v1229_v56 = vmax.f32 %v3953_v60, 0.0 }
 0x1f8   : > { %v1232_v50 = vmax.f32 %v3959_v34, 0.0  ;;  %3050 = vmatprep.subr.bf16.mxu1 %v3243_v59 }
 0x1f9   : > { %v1230_v4 = vmax.f32 %v3962_v49, 0.0 }
 0x1fa   : > { %v1260_v29 = vpack.c.bf16 %v1232_v50, %v1231_v6 }
 0x1fb   : > { %v1259_v12 = vpack.c.bf16 %v1230_v4, %v1229_v56  ;;  %3051 = vmatpush3.bf16.msra.mxu1 %v3243_v59 }
 0x1fc   : > { %3052 = vmatprep.subr.bf16.mxu1 %v3244_v55 }
 0x1fd   : > { %3016 = vmatprep.mubr.bf16.mxu1 %v1259_v12 }
 0x1fe   : > { %3017 = vmatmul.mubr.bf16.gmra.mrb[20].mxu1 %v1260_v29 }
 0x1ff   : > { %3053 = vmatpush3.bf16.msra.mxu1 %v3244_v55 }
 0x200   : > { %3054 = vmatprep.subr.bf16.mxu1 %v3245_v13 }
 0x203   : > { %v2974_v25 = vpop.f32.mrb[72].mxu0  ;;  %3055 = vmatpush3.bf16.msra.mxu1 %v3245_v13 }
 0x204   : > { %v1130_v53 = vpop.f32.mrb[73].mxu0  ;;  %v3986_v2 = vadd.f32 %v2974_v25, %v3917_v18 }
 0x205   : > { %v3983_v54 = vadd.f32 %v3917_v18, %v1130_v53  ;;  %v2975_v62 = vpop.f32.mrb[74].mxu0 }
 0x206   : > { %v3989_v8 = vadd.f32 %v2975_v62, %v3917_v18  ;;  %v1133_v10 = vpop.f32.mrb[75].mxu0  ;;  %v1235_v22 = vmax.f32 %v3986_v2, 0.0 }
 0x207   : > { %v3992_v11 = vadd.f32 %v3917_v18, %v1133_v10  ;;  %v1233_v20 = vmax.f32 %v3983_v54, 0.0 }
 0x208   : > { %v1236_v16 = vmax.f32 %v3989_v8, 0.0 }
 0x209   : > { %v1234_v21 = vmax.f32 %v3992_v11, 0.0 }
 0x20a   : > { %v1262_v27 = vpack.c.bf16 %v1236_v16, %v1235_v22 }
 0x20b   : > { %v1261_v26 = vpack.c.bf16 %v1234_v21, %v1233_v20 }
 0x20d   : > { %3020 = vmatprep.mubr.bf16.mxu1 %v1261_v26 }
 0x20e   : > { %3021 = vmatmul.mubr.bf16.gmra.mrb[24].mxu1 %v1262_v27 }
 0x213   : > { %v2978_v31 = vpop.f32.mrb[76].mxu0 }
 0x214   : > { %v1146_v32 = vpop.f32.mrb[77].mxu0  ;;  %v4010_v43 = vadd.f32 %v2978_v31, %v3917_v18 }
 0x215   : > { %v4007_v41 = vadd.f32 %v3917_v18, %v1146_v32  ;;  %v2979_v42 = vpop.f32.mrb[78].mxu0 }
 0x216   : > { %v4013_v51 = vadd.f32 %v2979_v42, %v3917_v18  ;;  %v1149_v57 = vpop.f32.mrb[79].mxu0  ;;  %v4791_v7 = vmax.f32 %v4010_v43, 0.0 }
 0x217   : > { %v4016_v63 = vadd.f32 %v3917_v18, %v1149_v57  ;;  %v1237_v1 = vmax.f32 %v4007_v41, 0.0  ;;  %v3246_v57 = vld [vmem:[%s4768_s8 + $0x30] sm:$0xff]  }
 0x218   : > { %v4790_v0 = vmax.f32 %v4013_v51, 0.0  ;;  %3056 = vmatprep.subr.bf16.mxu1 %v3246_v57 }
 0x219   : > { %v4789_v5 = vmax.f32 %v4016_v63, 0.0  ;;  %3057 = vmatpush3.bf16.msra.mxu1 %v3246_v57 }
 0x21a   : > { %v1264_v15 = vpack.c.bf16 %v4790_v0, %v4791_v7 }
 0x21b   : > { %v1263_v14 = vpack.c.bf16 %v4789_v5, %v1237_v1 }
 0x21d   : > { %3024 = vmatprep.mubr.bf16.mxu1 %v1263_v14 }
 0x21e   : > { %3025 = vmatmul.mubr.bf16.gmra.mrb[28].mxu1 %v1264_v15 }
 0x223   : > { %v2982_v17 = vpop.f32.mrb[0].mxu1 }
 0x224   : > { %v1162_v58 = vpop.f32.mrb[1].mxu1  ;;  %v4034_v61 = vadd.f32 %v2982_v17, %v3917_v18 }
 0x225   : > { %v4031_v30 = vadd.f32 %v3917_v18, %v1162_v58  ;;  %v2983_v35 = vpop.f32.mrb[2].mxu1 }
 0x226   : > { %v4037_v39 = vadd.f32 %v2983_v35, %v3917_v18  ;;  %v1165_v3 = vpop.f32.mrb[3].mxu1  ;;  %v4787_v44 = vmax.f32 %v4034_v61, 0.0 }
 0x227   : > { %v4040_v28 = vadd.f32 %v3917_v18, %v1165_v3  ;;  %v4788_v33 = vmax.f32 %v4031_v30, 0.0 }
 0x228   : > { %v4786_v9 = vmax.f32 %v4037_v39, 0.0 }
 0x229   : > { %v4785_v38 = vmax.f32 %v4040_v28, 0.0 }
 0x22a   : > { %v1266_v45 = vpack.c.bf16 %v4786_v9, %v4787_v44 }
 0x22b   : > { %v1265_v59 = vpack.c.bf16 %v4785_v38, %v4788_v33 }
 0x22d   : > { %3028 = vmatprep.mubr.bf16.mxu1 %v1265_v59 }
 0x22e   : > { %3029 = vmatmul.mubr.bf16.gmra.mrb[32].mxu1 %v1266_v45  ;;  %v3247_v45 = vld [vmem:[%s4768_s8 + $0x38] sm:$0xff]  }
 0x22f   : > { %3058 = vmatprep.subr.bf16.mxu1 %v3247_v45 }
 0x230   : > { %3059 = vmatpush3.bf16.msra.mxu1 %v3247_v45 }
 0x233   : > { %v2986_v40 = vpop.f32.mrb[4].mxu1 }
 0x234   : > { %v1178_v55 = vpop.f32.mrb[5].mxu1  ;;  %v4058_v13 = vadd.f32 %v2986_v40, %v3917_v18 }
 0x235   : > { %v4055_v12 = vadd.f32 %v3917_v18, %v1178_v55  ;;  %v2987_v29 = vpop.f32.mrb[6].mxu1 }
 0x236   : > { %v4061_v25 = vadd.f32 %v2987_v29, %v3917_v18  ;;  %v1181_v53 = vpop.f32.mrb[7].mxu1  ;;  %v4783_v31 = vmax.f32 %v4058_v13, 0.0 }
 0x237   : > { %v4064_v62 = vadd.f32 %v3917_v18, %v1181_v53  ;;  %v4784_v26 = vmax.f32 %v4055_v12, 0.0 }
 0x238   : > { %v4782_v10 = vmax.f32 %v4061_v25, 0.0 }
 0x239   : > { %v4773_v27 = vmax.f32 %v4064_v62, 0.0 }
 0x23a   : > { %v1268_v42 = vpack.c.bf16 %v4782_v10, %v4783_v31 }
 0x23b   : > { %v1267_v32 = vpack.c.bf16 %v4773_v27, %v4784_v26 }
 0x23d   : > { %3032 = vmatprep.mubr.bf16.mxu1 %v1267_v32 }
 0x23e   : > { %3033 = vmatmul.mubr.bf16.gmra.mrb[36].mxu1 %v1268_v42 }
 0x243   : > { %v2990_v14 = vpop.f32.mrb[8].mxu1 }
 0x244   : > { %v1194_v15 = vpop.f32.mrb[9].mxu1  ;;  %v4085_v35 = vadd.f32 %v2990_v14, %v3917_v18 }
 0x245   : > { %v4082_v17 = vadd.f32 %v3917_v18, %v1194_v15  ;;  %v2991_v58 = vpop.f32.mrb[10].mxu1 }
 0x246   : > { %v4088_v3 = vadd.f32 %v2991_v58, %v3917_v18  ;;  %v1197_v59 = vpop.f32.mrb[11].mxu1  ;;  %v4781_v32 = vmax.f32 %v4085_v35, 0.0 }
 0x247   : > { %v4094_v40 = vadd.f32 %v3917_v18, %v1197_v59  ;;  %v4775_v29 = vmax.f32 %v4082_v17, 0.0 }
 0x248   : > { %v4776_v55 = vmax.f32 %v4088_v3, 0.0 }
 0x249   : > { %v4774_v53 = vmax.f32 %v4094_v40, 0.0 }
 0x24a   : > { %v1270_v57 = vpack.c.bf16 %v4776_v55, %v4781_v32 }
 0x24b   : > { %v1269_v42 = vpack.c.bf16 %v4774_v53, %v4775_v29 }
 0x24d   : > { %3036 = vmatprep.mubr.bf16.mxu1 %v1269_v42 }
 0x24e   : > { %3037 = vmatmul.mubr.bf16.gmra.mrb[40].mxu1 %v1270_v57 }
 0x253   : > { %v2994_v14 = vpop.f32.mrb[12].mxu1 }
 0x254   : > { %v1210_v15 = vpop.f32.mrb[13].mxu1  ;;  %v4112_v45 = vadd.f32 %v2994_v14, %v3917_v18 }
 0x255   : > { %v4109_v58 = vadd.f32 %v3917_v18, %v1210_v15  ;;  %v2995_v59 = vpop.f32.mrb[14].mxu1 }
 0x256   : > { %v4115_v27 = vadd.f32 %v2995_v59, %v3917_v18  ;;  %v1213_v53 = vpop.f32.mrb[15].mxu1  ;;  %v4779_v15 = vmax.f32 %v4112_v45, 0.0 }
 0x257   : > { %v4118_v29 = vadd.f32 %v3917_v18, %v1213_v53  ;;  %v4780_v42 = vmax.f32 %v4109_v58, 0.0  ;;  %v3248_v18 = vld [vmem:[%s4766_s6 + $0x40] sm:$0xff]   ;;  %v3249_v53 = vld [vmem:[%s4766_s6 + $0x48] sm:$0xff]  }
 0x258   : > { %v4778_v55 = vmax.f32 %v4115_v27, 0.0  ;;  %3092 = vmatprep.subr.bf16.mxu0 %v3248_v18 }
 0x259   : > { %v4777_v57 = vmax.f32 %v4118_v29, 0.0  ;;  %3093 = vmatpush3.bf16.msra.mxu0 %v3248_v18  ;;  %v3251_v18 = vld [vmem:[%s4766_s6 + $0x58] sm:$0xff]  }
 0x25a   : > { %v1272_v59 = vpack.c.bf16 %v4778_v55, %v4779_v15  ;;  %3094 = vmatprep.subr.bf16.mxu0 %v3249_v53 }
 0x25b   : > { %v1271_v14 = vpack.c.bf16 %v4777_v57, %v4780_v42  ;;  %v4141_v57 = vld [vmem:[%s4767_s7] ss:$0 sm:$0xff] }
 0x25d   : > { %3040 = vmatprep.mubr.bf16.mxu1 %v1271_v14  ;;  %v3250_v14 = vld [vmem:[%s4766_s6 + $0x50] sm:$0xff]   ;;  %3095 = vmatpush3.bf16.msra.mxu0 %v3249_v53 }
 0x25e   : > { %3041 = vmatmul.mubr.bf16.gmra.mrb[44].mxu1 %v1272_v59  ;;  %3096 = vmatprep.subr.bf16.mxu0 %v3250_v14 }
 0x261   : > { %3097 = vmatpush3.bf16.msra.mxu0 %v3250_v14 }
 0x262   : > { %3098 = vmatprep.subr.bf16.mxu0 %v3251_v18 }
 0x265   : > { %3099 = vmatpush3.bf16.msra.mxu0 %v3251_v18 }
 0x2c1   : > { %v3014_v59 = vpop.f32.mrb[16].mxu1 }
 0x2c2   : > { %v1387_v55 = vadd.f32 %v3014_v59, %v4141_v57  ;;  %v1378_v15 = vpop.f32.mrb[17].mxu1 }
 0x2c3   : > { %v1379_v42 = vadd.f32 %v4141_v57, %v1378_v15  ;;  %v3015_v32 = vpop.f32.mrb[18].mxu1  ;;  %v3252_v15 = vld [vmem:[%s4766_s6 + $0x60] sm:$0xff]  }
 0x2c4   : > { %v1390_v10 = vadd.f32 %v3015_v32, %v4141_v57  ;;  %v1381_v31 = vpop.f32.mrb[19].mxu1  ;;  %v1507_v38 = vmax.f32 %v1387_v55, 0.0  ;;  %3100 = vmatprep.subr.bf16.mxu0 %v3252_v15 }
 0x2c5   : > { %v1382_v26 = vadd.f32 %v4141_v57, %v1381_v31  ;;  %v1505_v44 = vmax.f32 %v1379_v42, 0.0  ;;  %3101 = vmatpush3.bf16.msra.mxu0 %v3252_v15 }
 0x2c6   : > { %v1508_v9 = vmax.f32 %v1390_v10, 0.0 }
 0x2c7   : > { %v1506_v33 = vmax.f32 %v1382_v26, 0.0 }
 0x2c8   : > { %v1538_v59 = vpack.c.bf16 %v1508_v9, %v1507_v38 }
 0x2c9   : > { %v1537_v32 = vpack.c.bf16 %v1506_v33, %v1505_v44 }
 0x2cb   : > { %3060 = vmatprep.mubr.bf16.mxu1 %v1537_v32 }
 0x2cc   : > { %3061 = vmatmul.mubr.bf16.vlgmr.msra.gmra.mrb[48].mxu1 %v1538_v59 }
 0x2d1   : > { %v3018_v53 = vpop.f32.mrb[20].mxu1 }
 0x2d2   : > { %v1403_v31 = vadd.f32 %v3018_v53, %v4141_v57  ;;  %v1394_v55 = vpop.f32.mrb[21].mxu1 }
 0x2d3   : > { %v1395_v10 = vadd.f32 %v4141_v57, %v1394_v55  ;;  %v3019_v26 = vpop.f32.mrb[22].mxu1 }
 0x2d4   : > { %v1406_v9 = vadd.f32 %v3019_v26, %v4141_v57  ;;  %v1397_v38 = vpop.f32.mrb[23].mxu1  ;;  %v1511_v14 = vmax.f32 %v1403_v31, 0.0 }
 0x2d5   : > { %v1398_v42 = vadd.f32 %v4141_v57, %v1397_v38  ;;  %v1509_v33 = vmax.f32 %v1395_v10, 0.0 }
 0x2d6   : > { %v1512_v5 = vmax.f32 %v1406_v9, 0.0 }
 0x2d7   : > { %v1510_v44 = vmax.f32 %v1398_v42, 0.0 }
 0x2d8   : > { %v1540_v18 = vpack.c.bf16 %v1512_v5, %v1511_v14 }
 0x2d9   : > { %v1539_v59 = vpack.c.bf16 %v1510_v44, %v1509_v33 }
 0x2db   : > { %3064 = vmatprep.mubr.bf16.mxu1 %v1539_v59 }
 0x2dc   : > { %3065 = vmatmul.mubr.bf16.gmra.mrb[52].mxu1 %v1540_v18 }
 0x2e1   : > { %v3022_v15 = vpop.f32.mrb[24].mxu1 }
 0x2e2   : > { %v1419_v32 = vadd.f32 %v3022_v15, %v4141_v57  ;;  %v1410_v53 = vpop.f32.mrb[25].mxu1 }
 0x2e3   : > { %v1411_v55 = vadd.f32 %v4141_v57, %v1410_v53  ;;  %v3023_v0 = vpop.f32.mrb[26].mxu1 }
 0x2e4   : > { %v1422_v26 = vadd.f32 %v3023_v0, %v4141_v57  ;;  %v1413_v7 = vpop.f32.mrb[27].mxu1  ;;  %v1515_v31 = vmax.f32 %v1419_v32, 0.0 }
 0x2e5   : > { %v1414_v38 = vadd.f32 %v4141_v57, %v1413_v7  ;;  %v1513_v10 = vmax.f32 %v1411_v55, 0.0 }
 0x2e6   : > { %v1516_v9 = vmax.f32 %v1422_v26, 0.0 }
 0x2e7   : > { %v1514_v42 = vmax.f32 %v1414_v38, 0.0 }
 0x2e8   : > { %v1542_v5 = vpack.c.bf16 %v1516_v9, %v1515_v31 }
 0x2e9   : > { %v1541_v14 = vpack.c.bf16 %v1514_v42, %v1513_v10 }
 0x2eb   : > { %3068 = vmatprep.mubr.bf16.mxu1 %v1541_v14 }
 0x2ec   : > { %3069 = vmatmul.mubr.bf16.gmra.mrb[56].mxu1 %v1542_v5 }
 0x2f1   : > { %v3026_v33 = vpop.f32.mrb[28].mxu1 }
 0x2f2   : > { %v1435_v44 = vadd.f32 %v3026_v33, %v4141_v57  ;;  %v1426_v18 = vpop.f32.mrb[29].mxu1 }
 0x2f3   : > { %v1427_v59 = vadd.f32 %v4141_v57, %v1426_v18  ;;  %v3027_v15 = vpop.f32.mrb[30].mxu1 }
 0x2f4   : > { %v1438_v0 = vadd.f32 %v3027_v15, %v4141_v57  ;;  %v1429_v53 = vpop.f32.mrb[31].mxu1  ;;  %v1519_v32 = vmax.f32 %v1435_v44, 0.0 }
 0x2f5   : > { %v1430_v7 = vadd.f32 %v4141_v57, %v1429_v53  ;;  %v1517_v55 = vmax.f32 %v1427_v59, 0.0 }
 0x2f6   : > { %v1520_v26 = vmax.f32 %v1438_v0, 0.0 }
 0x2f7   : > { %v1518_v38 = vmax.f32 %v1430_v7, 0.0 }
 0x2f8   : > { %v1544_v31 = vpack.c.bf16 %v1520_v26, %v1519_v32 }
 0x2f9   : > { %v1543_v9 = vpack.c.bf16 %v1518_v38, %v1517_v55 }
 0x2fb   : > { %3072 = vmatprep.mubr.bf16.mxu1 %v1543_v9 }
 0x2fc   : > { %3073 = vmatmul.mubr.bf16.gmra.mrb[60].mxu1 %v1544_v31 }
 0x301   : > { %v3030_v10 = vpop.f32.mrb[32].mxu1 }
 0x302   : > { %v1451_v42 = vadd.f32 %v3030_v10, %v4141_v57  ;;  %v1442_v5 = vpop.f32.mrb[33].mxu1 }
 0x303   : > { %v1443_v14 = vadd.f32 %v4141_v57, %v1442_v5  ;;  %v3031_v33 = vpop.f32.mrb[34].mxu1 }
 0x304   : > { %v1454_v18 = vadd.f32 %v3031_v33, %v4141_v57  ;;  %v1445_v15 = vpop.f32.mrb[35].mxu1  ;;  %v1523_v44 = vmax.f32 %v1451_v42, 0.0 }
 0x305   : > { %v1446_v53 = vadd.f32 %v4141_v57, %v1445_v15  ;;  %v1521_v59 = vmax.f32 %v1443_v14, 0.0 }
 0x306   : > { %v1524_v0 = vmax.f32 %v1454_v18, 0.0 }
 0x307   : > { %v1522_v7 = vmax.f32 %v1446_v53, 0.0 }
 0x308   : > { %v1546_v32 = vpack.c.bf16 %v1524_v0, %v1523_v44 }
 0x309   : > { %v1545_v26 = vpack.c.bf16 %v1522_v7, %v1521_v59  ;;  %v3253_v59 = vld [vmem:[%s4766_s6 + $0x68] sm:$0xff]  }
 0x30a   : > { %3102 = vmatprep.subr.bf16.mxu0 %v3253_v59 }
 0x30b   : > { %3076 = vmatprep.mubr.bf16.mxu1 %v1545_v26  ;;  %3103 = vmatpush3.bf16.msra.mxu0 %v3253_v59 }
 0x30c   : > { %3077 = vmatmul.mubr.bf16.gmra.mrb[64].mxu1 %v1546_v32 }
 0x311   : > { %v3034_v55 = vpop.f32.mrb[36].mxu1 }
 0x312   : > { %v1467_v38 = vadd.f32 %v3034_v55, %v4141_v57  ;;  %v1458_v31 = vpop.f32.mrb[37].mxu1  ;;  %v3254_v55 = vld [vmem:[%s4766_s6 + $0x70] sm:$0xff]  }
 0x313   : > { %v1459_v9 = vadd.f32 %v4141_v57, %v1458_v31  ;;  %v3035_v10 = vpop.f32.mrb[38].mxu1  ;;  %3104 = vmatprep.subr.bf16.mxu0 %v3254_v55 }
 0x314   : > { %v1470_v5 = vadd.f32 %v3035_v10, %v4141_v57  ;;  %v1461_v33 = vpop.f32.mrb[39].mxu1  ;;  %v1527_v42 = vmax.f32 %v1467_v38, 0.0  ;;  %3105 = vmatpush3.bf16.msra.mxu0 %v3254_v55 }
 0x315   : > { %v1462_v15 = vadd.f32 %v4141_v57, %v1461_v33  ;;  %v1525_v14 = vmax.f32 %v1459_v9, 0.0 }
 0x316   : > { %v1528_v18 = vmax.f32 %v1470_v5, 0.0 }
 0x317   : > { %v1526_v53 = vmax.f32 %v1462_v15, 0.0 }
 0x318   : > { %v1548_v44 = vpack.c.bf16 %v1528_v18, %v1527_v42  ;;  %v3255_v42 = vld [vmem:[%s4766_s6 + $0x78] sm:$0xff]  }
 0x319   : > { %v1547_v0 = vpack.c.bf16 %v1526_v53, %v1525_v14  ;;  %3106 = vmatprep.subr.bf16.mxu0 %v3255_v42 }
 0x31a   : > { %3107 = vmatpush3.bf16.msra.mxu0 %v3255_v42 }
 0x31b   : > { %3080 = vmatprep.mubr.bf16.mxu1 %v1547_v0 }
 0x31c   : > { %3081 = vmatmul.mubr.bf16.gmra.mrb[68].mxu1 %v1548_v44 }
 0x321   : > { %v3038_v7 = vpop.f32.mrb[40].mxu1 }
 0x322   : > { %v1483_v32 = vadd.f32 %v3038_v7, %v4141_v57  ;;  %v1474_v26 = vpop.f32.mrb[41].mxu1 }
 0x323   : > { %v1475_v38 = vadd.f32 %v4141_v57, %v1474_v26  ;;  %v3039_v31 = vpop.f32.mrb[42].mxu1 }
 0x324   : > { %v1486_v9 = vadd.f32 %v3039_v31, %v4141_v57  ;;  %v1477_v10 = vpop.f32.mrb[43].mxu1  ;;  %v1531_v33 = vmax.f32 %v1483_v32, 0.0 }
 0x325   : > { %v1478_v5 = vadd.f32 %v4141_v57, %v1477_v10  ;;  %v1529_v18 = vmax.f32 %v1475_v38, 0.0 }
 0x326   : > { %v1532_v15 = vmax.f32 %v1486_v9, 0.0 }
 0x327   : > { %v1530_v14 = vmax.f32 %v1478_v5, 0.0 }
 0x328   : > { %v1550_v53 = vpack.c.bf16 %v1532_v15, %v1531_v33 }
 0x329   : > { %v1549_v44 = vpack.c.bf16 %v1530_v14, %v1529_v18  ;;  %v3256_v18 = vld [vmem:[%s4768_s8 + $0x40] sm:$0xff]   ;;  %v3257_v14 = vld [vmem:[%s4768_s8 + $0x48] sm:$0xff]  }
 0x32a   : > { %3140 = vmatprep.subr.bf16.mxu1 %v3256_v18 }
 0x32b   : > { %3084 = vmatprep.mubr.bf16.mxu1 %v1549_v44  ;;  %3141 = vmatpush3.bf16.msra.mxu1 %v3256_v18 }
 0x32c   : > { %3085 = vmatmul.mubr.bf16.gmra.mrb[72].mxu1 %v1550_v53  ;;  %3142 = vmatprep.subr.bf16.mxu1 %v3257_v14 }
 0x32f   : > { %3143 = vmatpush3.bf16.msra.mxu1 %v3257_v14 }
 0x331   : > { %v3042_v0 = vpop.f32.mrb[44].mxu1 }
 0x332   : > { %v1499_v59 = vadd.f32 %v3042_v0, %v4141_v57  ;;  %v1490_v7 = vpop.f32.mrb[45].mxu1 }
 0x333   : > { %v1491_v26 = vadd.f32 %v4141_v57, %v1490_v7  ;;  %v3043_v32 = vpop.f32.mrb[46].mxu1 }
 0x334   : > { %v1502_v55 = vadd.f32 %v3043_v32, %v4141_v57  ;;  %v1493_v31 = vpop.f32.mrb[47].mxu1  ;;  %v1535_v38 = vmax.f32 %v1499_v59, 0.0  ;;  %v3258_v59 = vld [vmem:[%s4768_s8 + $0x50] sm:$0xff]  }
 0x335   : > { %v1494_v9 = vadd.f32 %v4141_v57, %v1493_v31  ;;  %v1533_v5 = vmax.f32 %v1491_v26, 0.0  ;;  %v4202_v57 = vld [vmem:[%s4769_s9] ss:$0 sm:$0xff]  ;;  %3144 = vmatprep.subr.bf16.mxu1 %v3258_v59 }
 0x336   : > { %v1536_v10 = vmax.f32 %v1502_v55, 0.0  ;;  %3145 = vmatpush3.bf16.msra.mxu1 %v3258_v59 }
 0x337   : > { %v1534_v33 = vmax.f32 %v1494_v9, 0.0 }
 0x338   : > { %v1552_v15 = vpack.c.bf16 %v1536_v10, %v1535_v38 }
 0x339   : > { %v1551_v42 = vpack.c.bf16 %v1534_v33, %v1533_v5  ;;  %v3259_v5 = vld [vmem:[%s4768_s8 + $0x58] sm:$0xff]  }
 0x33a   : > { %3146 = vmatprep.subr.bf16.mxu1 %v3259_v5 }
 0x33b   : > { %3088 = vmatprep.mubr.bf16.mxu1 %v1551_v42  ;;  %3147 = vmatpush3.bf16.msra.mxu1 %v3259_v5 }
 0x33c   : > { %3089 = vmatmul.mubr.bf16.gmra.mrb[76].mxu1 %v1552_v15 }
 0x39f   : > { %v3062_v53 = vpop.f32.mrb[48].mxu1 }
 0x3a0   : > { %v1667_v44 = vadd.f32 %v3062_v53, %v4202_v57  ;;  %v1658_v0 = vpop.f32.mrb[49].mxu1 }
 0x3a1   : > { %v1659_v7 = vadd.f32 %v4202_v57, %v1658_v0  ;;  %v3063_v26 = vpop.f32.mrb[50].mxu1 }
 0x3a2   : > { %v1670_v32 = vadd.f32 %v3063_v26, %v4202_v57  ;;  %v1661_v55 = vpop.f32.mrb[51].mxu1  ;;  %v4217_v38 = vadd.f32 %v1667_v44, %v1227_v48  ;;  %v3261_v48 = vld [vmem:[%s4768_s8 + $0x68] sm:$0xff]  }
 0x3a3   : > { %v4212_v31 = vadd.f32 %v1659_v7, %v1225_v46  ;;  %v1662_v9 = vadd.f32 %v4202_v57, %v1661_v55 }
 0x3a4   : > { %v4221_v10 = vadd.f32 %v1670_v32, %v1228_v24  ;;  %v1819_v37 = vmax.f32 %v4217_v38, 0.0  ;;  %v3260_v24 = vld [vmem:[%s4768_s8 + $0x60] sm:$0xff]  }
 0x3a5   : > { %v4228_v19 = vadd.f32 %v1662_v9, %v1226_v47  ;;  %v1817_v33 = vmax.f32 %v4212_v31, 0.0  ;;  %3148 = vmatprep.subr.bf16.mxu1 %v3260_v24 }
 0x3a6   : > { %v1820_v46 = vmax.f32 %v4221_v10, 0.0  ;;  %3149 = vmatpush3.bf16.msra.mxu1 %v3260_v24 }
 0x3a7   : > { %v1818_v36 = vmax.f32 %v4228_v19, 0.0  ;;  %3150 = vmatprep.subr.bf16.mxu1 %v3261_v48 }
 0x3a8   : > { %v1850_v47 = vpack.c.bf16 %v1820_v46, %v1819_v37 }
 0x3a9   : > { %v1849_v23 = vpack.c.bf16 %v1818_v36, %v1817_v33 }
 0x3aa   : > { %3151 = vmatpush3.bf16.msra.mxu1 %v3261_v48 }
 0x3ab   : > { %3108 = vmatprep.mubr.bf16.mxu0 %v1849_v23 }
 0x3ac   : > { %3109 = vmatmul.mubr.bf16.vlgmr.msra.gmra.mrb[80].mxu0 %v1850_v47 }
 0x3af   : > { %v3066_v15 = vpop.f32.mrb[52].mxu1 }
 0x3b0   : > { %v1683_v42 = vadd.f32 %v3066_v15, %v4202_v57  ;;  %v1674_v18 = vpop.f32.mrb[53].mxu1 }
 0x3b1   : > { %v1675_v14 = vadd.f32 %v4202_v57, %v1674_v18  ;;  %v3067_v53 = vpop.f32.mrb[54].mxu1 }
 0x3b2   : > { %v1686_v44 = vadd.f32 %v3067_v53, %v4202_v57  ;;  %v1677_v0 = vpop.f32.mrb[55].mxu1  ;;  %v4258_v26 = vadd.f32 %v1683_v42, %v1231_v6 }
 0x3b3   : > { %v4253_v59 = vadd.f32 %v1675_v14, %v1229_v56  ;;  %v1678_v7 = vadd.f32 %v4202_v57, %v1677_v0 }
 0x3b4   : > { %v4262_v32 = vadd.f32 %v1686_v44, %v1232_v50  ;;  %v1823_v5 = vmax.f32 %v4258_v26, 0.0 }
 0x3b5   : > { %v4266_v55 = vadd.f32 %v1678_v7, %v1230_v4  ;;  %v1821_v60 = vmax.f32 %v4253_v59, 0.0 }
 0x3b6   : > { %v1824_v9 = vmax.f32 %v4262_v32, 0.0 }
 0x3b7   : > { %v1822_v56 = vmax.f32 %v4266_v55, 0.0 }
 0x3b8   : > { %v1852_v34 = vpack.c.bf16 %v1824_v9, %v1823_v5 }
 0x3b9   : > { %v1851_v52 = vpack.c.bf16 %v1822_v56, %v1821_v60 }
 0x3bb   : > { %3112 = vmatprep.mubr.bf16.mxu0 %v1851_v52 }
 0x3bc   : > { %3113 = vmatmul.mubr.bf16.gmra.mrb[84].mxu0 %v1852_v34 }
 0x3bf   : > { %v3070_v49 = vpop.f32.mrb[56].mxu1 }
 0x3c0   : > { %v1699_v50 = vadd.f32 %v3070_v49, %v4202_v57  ;;  %v1690_v4 = vpop.f32.mrb[57].mxu1 }
 0x3c1   : > { %v1691_v6 = vadd.f32 %v4202_v57, %v1690_v4  ;;  %v3071_v24 = vpop.f32.mrb[58].mxu1 }
 0x3c2   : > { %v1702_v23 = vadd.f32 %v3071_v24, %v4202_v57  ;;  %v1693_v47 = vpop.f32.mrb[59].mxu1  ;;  %v4290_v42 = vadd.f32 %v1699_v50, %v1235_v22  ;;  %v4840_v50 = vmax.f32 %v4010_v43, 0.0 }
 0x3c3   : > { %v4285_v48 = vadd.f32 %v1691_v6, %v1233_v20  ;;  %v1694_v15 = vadd.f32 %v4202_v57, %v1693_v47  ;;  %v4841_v6 = vmax.f32 %v4013_v51, 0.0 }
 0x3c4   : > { %v4294_v18 = vadd.f32 %v1702_v23, %v1236_v16  ;;  %v1827_v44 = vmax.f32 %v4290_v42, 0.0  ;;  %v4842_v23 = vmax.f32 %v4016_v63, 0.0 }
 0x3c5   : > { %v4298_v14 = vadd.f32 %v1694_v15, %v1234_v21  ;;  %v1825_v54 = vmax.f32 %v4285_v48, 0.0 }
 0x3c6   : > { %v1828_v53 = vmax.f32 %v4294_v18, 0.0 }
 0x3c7   : > { %v1826_v20 = vmax.f32 %v4298_v14, 0.0 }
 0x3c8   : > { %v1854_v8 = vpack.c.bf16 %v1828_v53, %v1827_v44 }
 0x3c9   : > { %v1853_v2 = vpack.c.bf16 %v1826_v20, %v1825_v54 }
 0x3cb   : > { %3116 = vmatprep.mubr.bf16.mxu0 %v1853_v2 }
 0x3cc   : > { %3117 = vmatmul.mubr.bf16.gmra.mrb[88].mxu0 %v1854_v8 }
 0x3cf   : > { %v3074_v11 = vpop.f32.mrb[60].mxu1 }
 0x3d0   : > { %v1715_v16 = vadd.f32 %v3074_v11, %v4202_v57  ;;  %v1706_v21 = vpop.f32.mrb[61].mxu1 }
 0x3d1   : > { %v1707_v22 = vadd.f32 %v4202_v57, %v1706_v21  ;;  %v3075_v0 = vpop.f32.mrb[62].mxu1 }
 0x3d2   : > { %v1718_v7 = vadd.f32 %v3075_v0, %v4202_v57  ;;  %v1709_v52 = vpop.f32.mrb[63].mxu1  ;;  %v4322_v4 = vadd.f32 %v1715_v16, %v4840_v50  ;;  %v4844_v50 = vmax.f32 %v4034_v61, 0.0 }
 0x3d3   : > { %v4317_v34 = vadd.f32 %v1707_v22, %v1237_v1  ;;  %v1710_v49 = vadd.f32 %v4202_v57, %v1709_v52 }
 0x3d4   : > { %v4326_v24 = vadd.f32 %v1718_v7, %v4841_v6  ;;  %v1831_v2 = vmax.f32 %v4322_v4, 0.0  ;;  %v4843_v7 = vmax.f32 %v4031_v30, 0.0 }
 0x3d5   : > { %v4330_v47 = vadd.f32 %v1710_v49, %v4842_v23  ;;  %v4810_v41 = vmax.f32 %v4317_v34, 0.0  ;;  %v4845_v23 = vmax.f32 %v4037_v39, 0.0 }
 0x3d6   : > { %v4809_v15 = vmax.f32 %v4326_v24, 0.0 }
 0x3d7   : > { %v4808_v1 = vmax.f32 %v4330_v47, 0.0 }
 0x3d8   : > { %v1856_v51 = vpack.c.bf16 %v4809_v15, %v1831_v2 }
 0x3d9   : > { %v1855_v43 = vpack.c.bf16 %v4808_v1, %v4810_v41 }
 0x3db   : > { %3120 = vmatprep.mubr.bf16.mxu0 %v1855_v43 }
 0x3dc   : > { %3121 = vmatmul.mubr.bf16.gmra.mrb[92].mxu0 %v1856_v51  ;;  %v4846_v51 = vmax.f32 %v4040_v28, 0.0 }
 0x3df   : > { %v3078_v63 = vpop.f32.mrb[64].mxu1 }
 0x3e0   : > { %v1731_v8 = vadd.f32 %v3078_v63, %v4202_v57  ;;  %v1722_v11 = vpop.f32.mrb[65].mxu1 }
 0x3e1   : > { %v1723_v16 = vadd.f32 %v4202_v57, %v1722_v11  ;;  %v3079_v21 = vpop.f32.mrb[66].mxu1 }
 0x3e2   : > { %v1734_v22 = vadd.f32 %v3079_v21, %v4202_v57  ;;  %v1725_v0 = vpop.f32.mrb[67].mxu1  ;;  %v4354_v6 = vadd.f32 %v1731_v8, %v4844_v50 }
 0x3e3   : > { %v4349_v52 = vadd.f32 %v1723_v16, %v4843_v7  ;;  %v1726_v49 = vadd.f32 %v4202_v57, %v1725_v0 }
 0x3e4   : > { %v4358_v43 = vadd.f32 %v1734_v22, %v4845_v23  ;;  %v4807_v21 = vmax.f32 %v4354_v6, 0.0  ;;  %v4847_v23 = vmax.f32 %v4055_v12, 0.0 }
 0x3e5   : > { %v4362_v63 = vadd.f32 %v1726_v49, %v4846_v51  ;;  %v4794_v30 = vmax.f32 %v4349_v52, 0.0 }
 0x3e6   : > { %v4793_v11 = vmax.f32 %v4358_v43, 0.0 }
 0x3e7   : > { %v4792_v16 = vmax.f32 %v4362_v63, 0.0 }
 0x3e8   : > { %v1858_v39 = vpack.c.bf16 %v4793_v11, %v4807_v21  ;;  %v4848_v11 = vmax.f32 %v4058_v13, 0.0 }
 0x3e9   : > { %v1857_v61 = vpack.c.bf16 %v4792_v16, %v4794_v30 }
 0x3eb   : > { %3124 = vmatprep.mubr.bf16.mxu0 %v1857_v61 }
 0x3ec   : > { %3125 = vmatmul.mubr.bf16.gmra.mrb[96].mxu0 %v1858_v39  ;;  %v4849_v39 = vmax.f32 %v4061_v25, 0.0 }
 0x3ef   : > { %v3082_v28 = vpop.f32.mrb[68].mxu1 }
 0x3f0   : > { %v1747_v8 = vadd.f32 %v3082_v28, %v4202_v57  ;;  %v1738_v22 = vpop.f32.mrb[69].mxu1 }
 0x3f1   : > { %v1739_v0 = vadd.f32 %v4202_v57, %v1738_v22  ;;  %v3083_v7 = vpop.f32.mrb[70].mxu1  ;;  %v4850_v22 = vmax.f32 %v4064_v62, 0.0 }
 0x3f2   : > { %v1750_v49 = vadd.f32 %v3083_v7, %v4202_v57  ;;  %v1741_v50 = vpop.f32.mrb[71].mxu1  ;;  %v4386_v61 = vadd.f32 %v1747_v8, %v4848_v11  ;;  %v3262_v8 = vld [vmem:[%s4768_s8 + $0x70] sm:$0xff]  }
 0x3f3   : > { %v4381_v51 = vadd.f32 %v1739_v0, %v4847_v23  ;;  %v1742_v16 = vadd.f32 %v4202_v57, %v1741_v50  ;;  %3152 = vmatprep.subr.bf16.mxu1 %v3262_v8 }
 0x3f4   : > { %v4390_v28 = vadd.f32 %v1750_v49, %v4849_v39  ;;  %v4798_v50 = vmax.f32 %v4386_v61, 0.0  ;;  %3153 = vmatpush3.bf16.msra.mxu1 %v3262_v8 }
 0x3f5   : > { %v4394_v30 = vadd.f32 %v1742_v16, %v4850_v22  ;;  %v4797_v12 = vmax.f32 %v4381_v51, 0.0 }
 0x3f6   : > { %v4796_v7 = vmax.f32 %v4390_v28, 0.0 }
 0x3f7   : > { %v4795_v0 = vmax.f32 %v4394_v30, 0.0 }
 0x3f8   : > { %v1860_v25 = vpack.c.bf16 %v4796_v7, %v4798_v50 }
 0x3f9   : > { %v1859_v13 = vpack.c.bf16 %v4795_v0, %v4797_v12  ;;  %v4851_v0 = vmax.f32 %v4082_v17, 0.0  ;;  %v4853_v12 = vmax.f32 %v4088_v3, 0.0 }
 0x3fb   : > { %3128 = vmatprep.mubr.bf16.mxu0 %v1859_v13 }
 0x3fc   : > { %3129 = vmatmul.mubr.bf16.gmra.mrb[100].mxu0 %v1860_v25  ;;  %v4852_v25 = vmax.f32 %v4085_v35, 0.0 }
 0x3ff   : > { %v3086_v62 = vpop.f32.mrb[72].mxu1 }
 0x400   : > { %v1763_v11 = vadd.f32 %v3086_v62, %v4202_v57  ;;  %v1754_v16 = vpop.f32.mrb[73].mxu1 }
 0x401   : > { %v1755_v49 = vadd.f32 %v4202_v57, %v1754_v16  ;;  %v3087_v23 = vpop.f32.mrb[74].mxu1  ;;  %v3263_v16 = vld [vmem:[%s4768_s8 + $0x78] sm:$0xff]  }
 0x402   : > { %v1766_v39 = vadd.f32 %v3087_v23, %v4202_v57  ;;  %v1757_v22 = vpop.f32.mrb[75].mxu1  ;;  %v4421_v62 = vadd.f32 %v1763_v11, %v4852_v25  ;;  %v4854_v23 = vmax.f32 %v4094_v40, 0.0  ;;  %3154 = vmatprep.subr.bf16.mxu1 %v3263_v16 }
 0x403   : > { %v4416_v7 = vadd.f32 %v1755_v49, %v4851_v0  ;;  %v1758_v13 = vadd.f32 %v4202_v57, %v1757_v22  ;;  %3155 = vmatpush3.bf16.msra.mxu1 %v3263_v16 }
 0x404   : > { %v4425_v50 = vadd.f32 %v1766_v39, %v4853_v12  ;;  %v4802_v3 = vmax.f32 %v4421_v62, 0.0 }
 0x405   : > { %v4432_v17 = vadd.f32 %v1758_v13, %v4854_v23  ;;  %v4800_v8 = vmax.f32 %v4416_v7, 0.0  ;;  %v4855_v23 = vmax.f32 %v4109_v58, 0.0 }
 0x406   : > { %v4801_v0 = vmax.f32 %v4425_v50, 0.0 }
 0x407   : > { %v4799_v35 = vmax.f32 %v4432_v17, 0.0 }
 0x408   : > { %v1862_v40 = vpack.c.bf16 %v4801_v0, %v4802_v3  ;;  %v4856_v0 = vmax.f32 %v4112_v45, 0.0 }
 0x409   : > { %v1861_v12 = vpack.c.bf16 %v4799_v35, %v4800_v8 }
 0x40b   : > { %3132 = vmatprep.mubr.bf16.mxu0 %v1861_v12 }
 0x40c   : > { %3133 = vmatmul.mubr.bf16.gmra.mrb[104].mxu0 %v1862_v40  ;;  %v4857_v40 = vmax.f32 %v4115_v27, 0.0 }
 0x40f   : > { %v3090_v11 = vpop.f32.mrb[76].mxu1 }
 0x410   : > { %v1779_v49 = vadd.f32 %v3090_v11, %v4202_v57  ;;  %v1770_v39 = vpop.f32.mrb[77].mxu1 }
 0x411   : > { %v1771_v22 = vadd.f32 %v4202_v57, %v1770_v39  ;;  %v3091_v13 = vpop.f32.mrb[78].mxu1  ;;  %v4858_v39 = vmax.f32 %v4118_v29, 0.0  ;;  %v4481_v29 = vld [vmem:[%s4767_s7 + $0x1] ss:$0 sm:$0xff] }
 0x412   : > { %v1782_v25 = vadd.f32 %v3091_v13, %v4202_v57  ;;  %v1773_v16 = vpop.f32.mrb[79].mxu1  ;;  %v4456_v12 = vadd.f32 %v1779_v49, %v4856_v0 }
 0x413   : > { %v4451_v35 = vadd.f32 %v1771_v22, %v4855_v23  ;;  %v1774_v8 = vadd.f32 %v4202_v57, %v1773_v16 }
 0x414   : > { %v4460_v11 = vadd.f32 %v1782_v25, %v4857_v40  ;;  %v4806_v57 = vmax.f32 %v4456_v12, 0.0 }
 0x415   : > { %v4464_v3 = vadd.f32 %v1774_v8, %v4858_v39  ;;  %v4805_v58 = vmax.f32 %v4451_v35, 0.0 }
 0x416   : > { %v4804_v13 = vmax.f32 %v4460_v11, 0.0 }
 0x417   : > { %v4803_v22 = vmax.f32 %v4464_v3, 0.0 }
 0x418   : > { %v1864_v27 = vpack.c.bf16 %v4804_v13, %v4806_v57 }
 0x419   : > { %v1863_v45 = vpack.c.bf16 %v4803_v22, %v4805_v58 }
 0x41b   : > { %3136 = vmatprep.mubr.bf16.mxu0 %v1863_v45 }
 0x41c   : > { %3137 = vmatmul.mubr.bf16.gmra.mrb[108].mxu0 %v1864_v27 }
 0x47f   : > { %v3110_v0 = vpop.f32.mrb[80].mxu0 }
 0x480   : > { %v1981_v8 = vadd.f32 %v3110_v0, %v4481_v29  ;;  %v1972_v49 = vpop.f32.mrb[81].mxu0 }
 0x481   : > { %v1973_v25 = vadd.f32 %v4481_v29, %v1972_v49  ;;  %v3111_v16 = vpop.f32.mrb[82].mxu0 }
 0x482   : > { %v1984_v23 = vadd.f32 %v3111_v16, %v4481_v29  ;;  %v1975_v40 = vpop.f32.mrb[83].mxu0  ;;  %v2101_v22 = vmax.f32 %v1981_v8, 0.0 }
 0x483   : > { %v1976_v39 = vadd.f32 %v4481_v29, %v1975_v40  ;;  %v2099_v27 = vmax.f32 %v1973_v25, 0.0 }
 0x484   : > { %v2102_v45 = vmax.f32 %v1984_v23, 0.0 }
 0x485   : > { %v2100_v13 = vmax.f32 %v1976_v39, 0.0 }
 0x486   : > { %v2132_v58 = vpack.c.bf16 %v2102_v45, %v2101_v22 }
 0x487   : > { %v2131_v57 = vpack.c.bf16 %v2100_v13, %v2099_v27 }
 0x489   : > { %3156 = vmatprep.mubr.bf16.mxu1 %v2131_v57 }
 0x48a   : > { %3157 = vmatmul.mubr.bf16.vlgmr.msra.gmra.mrb[80].mxu1 %v2132_v58 }
 0x48f   : > { %v3114_v21 = vpop.f32.mrb[84].mxu0 }
 0x490   : > { %v1997_v0 = vadd.f32 %v3114_v21, %v4481_v29  ;;  %v1988_v1 = vpop.f32.mrb[85].mxu0 }
 0x491   : > { %v1989_v49 = vadd.f32 %v4481_v29, %v1988_v1  ;;  %v3115_v15 = vpop.f32.mrb[86].mxu0 }
 0x492   : > { %v2000_v16 = vadd.f32 %v3115_v15, %v4481_v29  ;;  %v1991_v41 = vpop.f32.mrb[87].mxu0  ;;  %v2105_v8 = vmax.f32 %v1997_v0, 0.0 }
 0x493   : > { %v1992_v40 = vadd.f32 %v4481_v29, %v1991_v41  ;;  %v2103_v25 = vmax.f32 %v1989_v49, 0.0 }
 0x494   : > { %v2106_v23 = vmax.f32 %v2000_v16, 0.0 }
 0x495   : > { %v2104_v39 = vmax.f32 %v1992_v40, 0.0 }
 0x496   : > { %v2134_v22 = vpack.c.bf16 %v2106_v23, %v2105_v8 }
 0x497   : > { %v2133_v13 = vpack.c.bf16 %v2104_v39, %v2103_v25 }
 0x499   : > { %3160 = vmatprep.mubr.bf16.mxu1 %v2133_v13 }
 0x49a   : > { %3161 = vmatmul.mubr.bf16.gmra.mrb[84].mxu1 %v2134_v22 }
 0x49f   : > { %v3118_v58 = vpop.f32.mrb[88].mxu0 }
 0x4a0   : > { %v2013_v21 = vadd.f32 %v3118_v58, %v4481_v29  ;;  %v2004_v57 = vpop.f32.mrb[89].mxu0 }
 0x4a1   : > { %v2005_v1 = vadd.f32 %v4481_v29, %v2004_v57  ;;  %v3119_v45 = vpop.f32.mrb[90].mxu0 }
 0x4a2   : > { %v2016_v15 = vadd.f32 %v3119_v45, %v4481_v29  ;;  %v2007_v27 = vpop.f32.mrb[91].mxu0  ;;  %v2109_v0 = vmax.f32 %v2013_v21, 0.0 }
 0x4a3   : > { %v2008_v41 = vadd.f32 %v4481_v29, %v2007_v27  ;;  %v2107_v49 = vmax.f32 %v2005_v1, 0.0 }
 0x4a4   : > { %v2110_v16 = vmax.f32 %v2016_v15, 0.0 }
 0x4a5   : > { %v2108_v40 = vmax.f32 %v2008_v41, 0.0 }
 0x4a6   : > { %v2136_v8 = vpack.c.bf16 %v2110_v16, %v2109_v0 }
 0x4a7   : > { %v2135_v23 = vpack.c.bf16 %v2108_v40, %v2107_v49 }
 0x4a9   : > { %3164 = vmatprep.mubr.bf16.mxu1 %v2135_v23 }
 0x4aa   : > { %3165 = vmatmul.mubr.bf16.gmra.mrb[88].mxu1 %v2136_v8 }
 0x4af   : > { %v3122_v25 = vpop.f32.mrb[92].mxu0 }
 0x4b0   : > { %v2029_v39 = vadd.f32 %v3122_v25, %v4481_v29  ;;  %v2020_v22 = vpop.f32.mrb[93].mxu0 }
 0x4b1   : > { %v2021_v13 = vadd.f32 %v4481_v29, %v2020_v22  ;;  %v3123_v58 = vpop.f32.mrb[94].mxu0 }
 0x4b2   : > { %v2032_v57 = vadd.f32 %v3123_v58, %v4481_v29  ;;  %v2023_v45 = vpop.f32.mrb[95].mxu0  ;;  %v2113_v21 = vmax.f32 %v2029_v39, 0.0 }
 0x4b3   : > { %v2024_v27 = vadd.f32 %v4481_v29, %v2023_v45  ;;  %v2111_v1 = vmax.f32 %v2021_v13, 0.0 }
 0x4b4   : > { %v2114_v15 = vmax.f32 %v2032_v57, 0.0 }
 0x4b5   : > { %v2112_v41 = vmax.f32 %v2024_v27, 0.0 }
 0x4b6   : > { %v2138_v0 = vpack.c.bf16 %v2114_v15, %v2113_v21 }
 0x4b7   : > { %v2137_v16 = vpack.c.bf16 %v2112_v41, %v2111_v1 }
 0x4b9   : > { %3168 = vmatprep.mubr.bf16.mxu1 %v2137_v16 }
 0x4ba   : > { %3169 = vmatmul.mubr.bf16.gmra.mrb[92].mxu1 %v2138_v0 }
 0x4bf   : > { %v3126_v49 = vpop.f32.mrb[96].mxu0 }
 0x4c0   : > { %v2045_v40 = vadd.f32 %v3126_v49, %v4481_v29  ;;  %v2036_v8 = vpop.f32.mrb[97].mxu0 }
 0x4c1   : > { %v2037_v23 = vadd.f32 %v4481_v29, %v2036_v8  ;;  %v3127_v25 = vpop.f32.mrb[98].mxu0 }
 0x4c2   : > { %v2048_v22 = vadd.f32 %v3127_v25, %v4481_v29  ;;  %v2039_v58 = vpop.f32.mrb[99].mxu0  ;;  %v2117_v39 = vmax.f32 %v2045_v40, 0.0 }
 0x4c3   : > { %v2040_v45 = vadd.f32 %v4481_v29, %v2039_v58  ;;  %v2115_v13 = vmax.f32 %v2037_v23, 0.0 }
 0x4c4   : > { %v2118_v57 = vmax.f32 %v2048_v22, 0.0 }
 0x4c5   : > { %v2116_v27 = vmax.f32 %v2040_v45, 0.0 }
 0x4c6   : > { %v2140_v21 = vpack.c.bf16 %v2118_v57, %v2117_v39 }
 0x4c7   : > { %v2139_v15 = vpack.c.bf16 %v2116_v27, %v2115_v13 }
 0x4c9   : > { %3172 = vmatprep.mubr.bf16.mxu1 %v2139_v15 }
 0x4ca   : > { %3173 = vmatmul.mubr.bf16.gmra.mrb[96].mxu1 %v2140_v21 }
 0x4cf   : > { %v3130_v1 = vpop.f32.mrb[100].mxu0 }
 0x4d0   : > { %v2061_v41 = vadd.f32 %v3130_v1, %v4481_v29  ;;  %v2052_v0 = vpop.f32.mrb[101].mxu0 }
 0x4d1   : > { %v2053_v16 = vadd.f32 %v4481_v29, %v2052_v0  ;;  %v3131_v49 = vpop.f32.mrb[102].mxu0 }
 0x4d2   : > { %v2064_v8 = vadd.f32 %v3131_v49, %v4481_v29  ;;  %v2055_v25 = vpop.f32.mrb[103].mxu0  ;;  %v2121_v40 = vmax.f32 %v2061_v41, 0.0 }
 0x4d3   : > { %v2056_v58 = vadd.f32 %v4481_v29, %v2055_v25  ;;  %v2119_v23 = vmax.f32 %v2053_v16, 0.0 }
 0x4d4   : > { %v2122_v22 = vmax.f32 %v2064_v8, 0.0 }
 0x4d5   : > { %v2120_v45 = vmax.f32 %v2056_v58, 0.0 }
 0x4d6   : > { %v2142_v39 = vpack.c.bf16 %v2122_v22, %v2121_v40 }
 0x4d7   : > { %v2141_v57 = vpack.c.bf16 %v2120_v45, %v2119_v23 }
 0x4d9   : > { %3176 = vmatprep.mubr.bf16.mxu1 %v2141_v57 }
 0x4da   : > { %3177 = vmatmul.mubr.bf16.gmra.mrb[100].mxu1 %v2142_v39 }
 0x4df   : > { %v3134_v13 = vpop.f32.mrb[104].mxu0 }
 0x4e0   : > { %v2077_v27 = vadd.f32 %v3134_v13, %v4481_v29  ;;  %v2068_v21 = vpop.f32.mrb[105].mxu0 }
 0x4e1   : > { %v2069_v15 = vadd.f32 %v4481_v29, %v2068_v21  ;;  %v3135_v1 = vpop.f32.mrb[106].mxu0 }
 0x4e2   : > { %v2080_v0 = vadd.f32 %v3135_v1, %v4481_v29  ;;  %v2071_v49 = vpop.f32.mrb[107].mxu0  ;;  %v2125_v41 = vmax.f32 %v2077_v27, 0.0 }
 0x4e3   : > { %v2072_v25 = vadd.f32 %v4481_v29, %v2071_v49  ;;  %v2123_v16 = vmax.f32 %v2069_v15, 0.0 }
 0x4e4   : > { %v2126_v8 = vmax.f32 %v2080_v0, 0.0 }
 0x4e5   : > { %v2124_v58 = vmax.f32 %v2072_v25, 0.0 }
 0x4e6   : > { %v2144_v40 = vpack.c.bf16 %v2126_v8, %v2125_v41 }
 0x4e7   : > { %v2143_v22 = vpack.c.bf16 %v2124_v58, %v2123_v16  ;;  %v4518_v16 = vld [vmem:[%s4769_s9 + $0x1] ss:$0 sm:$0xff] }
 0x4e9   : > { %3180 = vmatprep.mubr.bf16.mxu1 %v2143_v22 }
 0x4ea   : > { %3181 = vmatmul.mubr.bf16.gmra.mrb[104].mxu1 %v2144_v40 }
 0x4ef   : > { %v3138_v23 = vpop.f32.mrb[108].mxu0 }
 0x4f0   : > { %v2093_v45 = vadd.f32 %v3138_v23, %v4481_v29  ;;  %v2084_v39 = vpop.f32.mrb[109].mxu0 }
 0x4f1   : > { %v2085_v57 = vadd.f32 %v4481_v29, %v2084_v39  ;;  %v3139_v13 = vpop.f32.mrb[110].mxu0 }
 0x4f2   : > { %v2096_v21 = vadd.f32 %v3139_v13, %v4481_v29  ;;  %v2087_v1 = vpop.f32.mrb[111].mxu0  ;;  %v2129_v27 = vmax.f32 %v2093_v45, 0.0 }
 0x4f3   : > { %v2088_v49 = vadd.f32 %v4481_v29, %v2087_v1  ;;  %v2127_v15 = vmax.f32 %v2085_v57, 0.0 }
 0x4f4   : > { %v2130_v0 = vmax.f32 %v2096_v21, 0.0  ;;  %v4529_v21 = vld [vmem:[%s4770_s10] ss:$0 sm:$0xff] }
 0x4f5   : > { %v2128_v25 = vmax.f32 %v2088_v49, 0.0 }
 0x4f6   : > { %v2146_v41 = vpack.c.bf16 %v2130_v0, %v2129_v27 }
 0x4f7   : > { %v2145_v8 = vpack.c.bf16 %v2128_v25, %v2127_v15 }
 0x4f9   : > { %3184 = vmatprep.mubr.bf16.mxu1 %v2145_v8 }
 0x4fa   : > { %3185 = vmatmul.mubr.bf16.gmra.mrb[108].mxu1 %v2146_v41 }
 0x55d   : > { %v3158_v58 = vpop.f32.mrb[80].mxu1 }
 0x55e   : > { %v2263_v40 = vadd.f32 %v3158_v58, %v4518_v16  ;;  %v2254_v22 = vpop.f32.mrb[81].mxu1 }
 0x55f   : > { %v2255_v23 = vadd.f32 %v4518_v16, %v2254_v22  ;;  %v3159_v29 = vpop.f32.mrb[82].mxu1 }
 0x560   : > { %v2266_v45 = vadd.f32 %v3159_v29, %v4518_v16  ;;  %v2257_v39 = vpop.f32.mrb[83].mxu1  ;;  %v2383_v57 = vadd.f32 %v2263_v40, %v1819_v37 }
 0x561   : > { %v2258_v13 = vadd.f32 %v4518_v16, %v2257_v39  ;;  %v2381_v1 = vadd.f32 %v2255_v23, %v1817_v33 }
 0x562   : > { %v2384_v49 = vadd.f32 %v2266_v45, %v1820_v46  ;;  %v2415_v27 = vmax.f32 %v2383_v57, 0.0 }
 0x563   : > { %v2382_v0 = vadd.f32 %v2258_v13, %v1818_v36  ;;  %v2413_v15 = vmax.f32 %v2381_v1, 0.0 }
 0x564   : > { %v2416_v38 = vmax.f32 %v2384_v49, 0.0  ;;  %v2454_v37 = vmul.f32 %v4529_v21, %v2415_v27 }
 0x565   : > { %v2414_v25 = vmax.f32 %v2382_v0, 0.0  ;;  %v2452_v41 = vmul.f32 %v4529_v21, %v2413_v15 }
 0x566   : > { %2488 = vadd.xlane.f32.xlu1 %v2454_v37  ;;  %v2455_v8 = vmul.f32 %v4529_v21, %v2416_v38 }
 0x567   : > { %2484 = vadd.xlane.f32.xlu0 %v2452_v41  ;;  %v2453_v31 = vmul.f32 %v4529_v21, %v2414_v25 }
 0x56a   : > { %2490 = vadd.xlane.f32.xlu1 %v2455_v8 }
 0x56b   : > { %2486 = vadd.xlane.f32.xlu0 %v2453_v31 }
 0x56d   : > { %v3162_v10 = vpop.f32.mrb[84].mxu1 }
 0x56e   : > { %v2279_v46 = vadd.f32 %v3162_v10, %v4518_v16  ;;  %v2270_v19 = vpop.f32.mrb[85].mxu1 }
 0x56f   : > { %v2271_v33 = vadd.f32 %v4518_v16, %v2270_v19  ;;  %v3163_v36 = vpop.f32.mrb[86].mxu1 }
 0x570   : > { %v2387_v58 = vadd.f32 %v2279_v46, %v1823_v5  ;;  %v2282_v40 = vadd.f32 %v3163_v36, %v4518_v16  ;;  %v2273_v22 = vpop.f32.mrb[87].mxu1 }
 0x571   : > { %v2385_v23 = vadd.f32 %v2271_v33, %v1821_v60  ;;  %v2274_v29 = vadd.f32 %v4518_v16, %v2273_v22  ;;  %v4859_v22 = vmax.f32 %v4317_v34, 0.0 }
 0x572   : > { %v2419_v45 = vmax.f32 %v2387_v58, 0.0  ;;  %v2388_v39 = vadd.f32 %v2282_v40, %v1824_v9 }
 0x573   : > { %v2386_v57 = vadd.f32 %v2274_v29, %v1822_v56  ;;  %v2417_v13 = vmax.f32 %v2385_v23, 0.0 }
 0x574   : > { %v2420_v1 = vmax.f32 %v2388_v39, 0.0  ;;  %v2458_v26 = vmul.f32 %v4529_v21, %v2419_v45  ;;  %v4860_v39 = vmax.f32 %v4326_v24, 0.0 }
 0x575   : > { %v2418_v5 = vmax.f32 %v2386_v57, 0.0  ;;  %v2456_v59 = vmul.f32 %v4529_v21, %v2417_v13  ;;  %v4861_v13 = vmax.f32 %v4330_v47, 0.0 }
 0x576   : > { %2496 = vadd.xlane.f32.xlu0 %v2458_v26  ;;  %v2459_v49 = vmul.f32 %v4529_v21, %v2420_v1 }
 0x577   : > { %v2457_v60 = vmul.f32 %v4529_v21, %v2418_v5 }
 0x578   : > { %2498 = vadd.xlane.f32.xlu1 %v2459_v49 }
 0x57a   : > { %2492 = vadd.xlane.f32.xlu0 %v2456_v59 }
 0x57c   : > { %2494 = vadd.xlane.f32.xlu1 %v2457_v60 }
 0x57d   : > { %v3166_v32 = vpop.f32.mrb[88].mxu1 }
 0x57e   : > { %v2295_v9 = vadd.f32 %v3166_v32, %v4518_v16  ;;  %v2286_v55 = vpop.f32.mrb[89].mxu1 }
 0x57f   : > { %v2287_v56 = vadd.f32 %v4518_v16, %v2286_v55  ;;  %v3167_v27 = vpop.f32.mrb[90].mxu1  ;;  %v4862_v55 = vmax.f32 %v4354_v6, 0.0 }
 0x580   : > { %v2391_v0 = vadd.f32 %v2295_v9, %v1827_v44  ;;  %v2298_v15 = vadd.f32 %v3167_v27, %v4518_v16  ;;  %v2289_v38 = vpop.f32.mrb[91].mxu1 }
 0x581   : > { %v2389_v37 = vadd.f32 %v2287_v56, %v1825_v54  ;;  %v2290_v25 = vadd.f32 %v4518_v16, %v2289_v38 }
 0x582   : > { %v2423_v41 = vmax.f32 %v2391_v0, 0.0  ;;  %v2392_v8 = vadd.f32 %v2298_v15, %v1828_v53  ;;  %v4863_v15 = vmax.f32 %v4349_v52, 0.0 }
 0x583   : > { %v2390_v31 = vadd.f32 %v2290_v25, %v1826_v20  ;;  %v2421_v10 = vmax.f32 %v2389_v37, 0.0 }
 0x584   : > { %v2424_v46 = vmax.f32 %v2392_v8, 0.0  ;;  %v2462_v42 = vmul.f32 %v4529_v21, %v2423_v41  ;;  %v4864_v41 = vmax.f32 %v4358_v43, 0.0 }
 0x585   : > { %v2422_v44 = vmax.f32 %v2390_v31, 0.0  ;;  %v2460_v48 = vmul.f32 %v4529_v21, %v2421_v10  ;;  %v4865_v31 = vmax.f32 %v4362_v63, 0.0 }
 0x586   : > { %2504 = vadd.xlane.f32.xlu0 %v2462_v42  ;;  %v2463_v19 = vmul.f32 %v4529_v21, %v2424_v46 }
 0x587   : > { %v2461_v54 = vmul.f32 %v4529_v21, %v2422_v44 }
 0x588   : > { %2506 = vadd.xlane.f32.xlu1 %v2463_v19 }
 0x58a   : > { %2500 = vadd.xlane.f32.xlu0 %v2460_v48 }
 0x58c   : > { %2502 = vadd.xlane.f32.xlu1 %v2461_v54 }
 0x58d   : > { %v3170_v18 = vpop.f32.mrb[92].mxu1 }
 0x58e   : > { %v2311_v53 = vadd.f32 %v3170_v18, %v4518_v16  ;;  %v2302_v14 = vpop.f32.mrb[93].mxu1 }
 0x58f   : > { %v2303_v20 = vadd.f32 %v4518_v16, %v2302_v14  ;;  %v3171_v33 = vpop.f32.mrb[94].mxu1  ;;  %v4866_v14 = vmax.f32 %v4386_v61, 0.0 }
 0x590   : > { %v2395_v36 = vadd.f32 %v2311_v53, %v1831_v2  ;;  %v2314_v58 = vadd.f32 %v3171_v33, %v4518_v16  ;;  %v2305_v40 = vpop.f32.mrb[95].mxu1 }
 0x591   : > { %v2393_v23 = vadd.f32 %v2303_v20, %v4859_v22  ;;  %v2306_v29 = vadd.f32 %v4518_v16, %v2305_v40 }
 0x592   : > { %v2427_v45 = vmax.f32 %v2395_v36, 0.0  ;;  %v2396_v57 = vadd.f32 %v2314_v58, %v4860_v39  ;;  %v4867_v58 = vmax.f32 %v4381_v51, 0.0  ;;  %v4869_v39 = vmax.f32 %v4394_v30, 0.0 }
 0x593   : > { %v2394_v1 = vadd.f32 %v2306_v29, %v4861_v13  ;;  %v2425_v26 = vmax.f32 %v2393_v23, 0.0  ;;  %v4868_v29 = vmax.f32 %v4390_v28, 0.0 }
 0x594   : > { %v2428_v5 = vmax.f32 %v2396_v57, 0.0  ;;  %v2466_v4 = vmul.f32 %v4529_v21, %v2427_v45 }
 0x595   : > { %v2426_v2 = vmax.f32 %v2394_v1, 0.0  ;;  %v2464_v34 = vmul.f32 %v4529_v21, %v2425_v26 }
 0x596   : > { %2512 = vadd.xlane.f32.xlu0 %v2466_v4  ;;  %v2467_v49 = vmul.f32 %v4529_v21, %v2428_v5 }
 0x597   : > { %v2465_v59 = vmul.f32 %v4529_v21, %v2426_v2 }
 0x598   : > { %2514 = vadd.xlane.f32.xlu1 %v2467_v49 }
 0x59a   : > { %2508 = vadd.xlane.f32.xlu0 %v2464_v34 }
 0x59c   : > { %2510 = vadd.xlane.f32.xlu1 %v2465_v59  ;;  %v4870_v59 = vmax.f32 %v4421_v62, 0.0 }
 0x59d   : > { %v3174_v24 = vpop.f32.mrb[96].mxu1 }
 0x59e   : > { %v2327_v60 = vadd.f32 %v3174_v24, %v4518_v16  ;;  %v2318_v47 = vpop.f32.mrb[97].mxu1 }
 0x59f   : > { %v2319_v32 = vadd.f32 %v4518_v16, %v2318_v47  ;;  %v3175_v9 = vpop.f32.mrb[98].mxu1 }
 0x5a0   : > { %v2399_v56 = vadd.f32 %v2327_v60, %v4862_v55  ;;  %v2330_v27 = vadd.f32 %v3175_v9, %v4518_v16  ;;  %v2321_v0 = vpop.f32.mrb[99].mxu1 }
 0x5a1   : > { %v2397_v38 = vadd.f32 %v2319_v32, %v4863_v15  ;;  %v2322_v37 = vadd.f32 %v4518_v16, %v2321_v0  ;;  %v4871_v32 = vmax.f32 %v4416_v7, 0.0  ;;  %v4873_v15 = vmax.f32 %v4432_v17, 0.0 }
 0x5a2   : > { %v2431_v25 = vmax.f32 %v2399_v56, 0.0  ;;  %v2400_v8 = vadd.f32 %v2330_v27, %v4864_v41  ;;  %v4872_v27 = vmax.f32 %v4425_v50, 0.0 }
 0x5a3   : > { %v2398_v10 = vadd.f32 %v2322_v37, %v4865_v31  ;;  %v2429_v46 = vmax.f32 %v2397_v38, 0.0 }
 0x5a4   : > { %v2432_v42 = vmax.f32 %v2400_v8, 0.0  ;;  %v2470_v6 = vmul.f32 %v4529_v21, %v2431_v25 }
 0x5a5   : > { %v2430_v44 = vmax.f32 %v2398_v10, 0.0  ;;  %v2468_v52 = vmul.f32 %v4529_v21, %v2429_v46 }
 0x5a6   : > { %2520 = vadd.xlane.f32.xlu0 %v2470_v6  ;;  %v2471_v19 = vmul.f32 %v4529_v21, %v2432_v42 }
 0x5a7   : > { %v2469_v48 = vmul.f32 %v4529_v21, %v2430_v44 }
 0x5a8   : > { %2522 = vadd.xlane.f32.xlu1 %v2471_v19  ;;  %v4874_v19 = vmax.f32 %v4456_v12, 0.0 }
 0x5aa   : > { %2516 = vadd.xlane.f32.xlu0 %v2468_v52 }
 0x5ac   : > { %2518 = vadd.xlane.f32.xlu1 %v2469_v48  ;;  %v4875_v48 = vmax.f32 %v4451_v35, 0.0 }
 0x5ad   : > { %v3178_v43 = vpop.f32.mrb[100].mxu1 }
 0x5ae   : > { %v2343_v54 = vadd.f32 %v3178_v43, %v4518_v16  ;;  %v2334_v63 = vpop.f32.mrb[101].mxu1 }
 0x5af   : > { %v2335_v18 = vadd.f32 %v4518_v16, %v2334_v63  ;;  %v3179_v53 = vpop.f32.mrb[102].mxu1 }
 0x5b0   : > { %v2403_v20 = vadd.f32 %v2343_v54, %v4866_v14  ;;  %v2346_v33 = vadd.f32 %v3179_v53, %v4518_v16  ;;  %v2337_v36 = vpop.f32.mrb[103].mxu1  ;;  %v4877_v14 = vmax.f32 %v4464_v3, 0.0 }
 0x5b1   : > { %v2401_v40 = vadd.f32 %v2335_v18, %v4867_v58  ;;  %v2338_v22 = vadd.f32 %v4518_v16, %v2337_v36  ;;  %v4876_v18 = vmax.f32 %v4460_v11, 0.0  ;;  %v4654_v11 = vld [vmem:[#allocation2] ss:$0 sm:$0xff] }
 0x5b2   : > { %v2435_v23 = vmax.f32 %v2403_v20, 0.0  ;;  %v2404_v45 = vadd.f32 %v2346_v33, %v4868_v29 }
 0x5b3   : > { %v2402_v57 = vadd.f32 %v2338_v22, %v4869_v39  ;;  %v2433_v13 = vmax.f32 %v2401_v40, 0.0 }
 0x5b4   : > { %v2436_v1 = vmax.f32 %v2404_v45, 0.0  ;;  %v2474_v61 = vmul.f32 %v4529_v21, %v2435_v23 }
 0x5b5   : > { %v2434_v26 = vmax.f32 %v2402_v57, 0.0  ;;  %v2472_v51 = vmul.f32 %v4529_v21, %v2433_v13 }
 0x5b6   : > { %2528 = vadd.xlane.f32.xlu0 %v2474_v61  ;;  %v2475_v5 = vmul.f32 %v4529_v21, %v2436_v1 }
 0x5b7   : > { %v2473_v4 = vmul.f32 %v4529_v21, %v2434_v26 }
 0x5b8   : > { %2530 = vadd.xlane.f32.xlu1 %v2475_v5 }
 0x5ba   : > { %2524 = vadd.xlane.f32.xlu0 %v2472_v51 }
 0x5bc   : > { %2526 = vadd.xlane.f32.xlu1 %v2473_v4 }
 0x5bd   : > { %v3182_v28 = vpop.f32.mrb[104].mxu1 }
 0x5be   : > { %v2359_v2 = vadd.f32 %v3182_v28, %v4518_v16  ;;  %v2350_v30 = vpop.f32.mrb[105].mxu1 }
 0x5bf   : > { %v2351_v49 = vadd.f32 %v4518_v16, %v2350_v30  ;;  %v3183_v34 = vpop.f32.mrb[106].mxu1 }
 0x5c0   : > { %v2407_v24 = vadd.f32 %v2359_v2, %v4870_v59  ;;  %v2362_v60 = vadd.f32 %v3183_v34, %v4518_v16  ;;  %v2353_v47 = vpop.f32.mrb[107].mxu1 }
 0x5c1   : > { %v2405_v9 = vadd.f32 %v2351_v49, %v4871_v32  ;;  %v2354_v55 = vadd.f32 %v4518_v16, %v2353_v47 }
 0x5c2   : > { %v2439_v56 = vmax.f32 %v2407_v24, 0.0  ;;  %v2408_v0 = vadd.f32 %v2362_v60, %v4872_v27 }
 0x5c3   : > { %v2406_v38 = vadd.f32 %v2354_v55, %v4873_v15  ;;  %v2437_v37 = vmax.f32 %v2405_v9, 0.0 }
 0x5c4   : > { %v2440_v25 = vmax.f32 %v2408_v0, 0.0  ;;  %v2478_v62 = vmul.f32 %v4529_v21, %v2439_v56 }
 0x5c5   : > { %v2438_v41 = vmax.f32 %v2406_v38, 0.0  ;;  %v2476_v7 = vmul.f32 %v4529_v21, %v2437_v37 }
 0x5c6   : > { %2536 = vadd.xlane.f32.xlu0 %v2478_v62  ;;  %v2479_v8 = vmul.f32 %v4529_v21, %v2440_v25 }
 0x5c7   : > { %v2477_v31 = vmul.f32 %v4529_v21, %v2438_v41 }
 0x5c8   : > { %2538 = vadd.xlane.f32.xlu1 %v2479_v8 }
 0x5ca   : > { %2532 = vadd.xlane.f32.xlu0 %v2476_v7 }
 0x5cc   : > { %2534 = vadd.xlane.f32.xlu1 %v2477_v31 }
 0x5cd   : > { %v3186_v50 = vpop.f32.mrb[108].mxu1 }
 0x5ce   : > { %v2375_v10 = vadd.f32 %v3186_v50, %v4518_v16  ;;  %v2366_v17 = vpop.f32.mrb[109].mxu1 }
 0x5cf   : > { %v2367_v46 = vadd.f32 %v4518_v16, %v2366_v17  ;;  %v3187_v42 = vpop.f32.mrb[110].mxu1 }
 0x5d0   : > { %v2378_v6 = vadd.f32 %v3187_v42, %v4518_v16  ;;  %v2369_v44 = vpop.f32.mrb[111].mxu1  ;;  %v2411_v52 = vadd.f32 %v2375_v10, %v4874_v19 }
 0x5d1   : > { %v2409_v43 = vadd.f32 %v2367_v46, %v4875_v48  ;;  %v2370_v54 = vadd.f32 %v4518_v16, %v2369_v44 }
 0x5d2   : > { %v2412_v53 = vadd.f32 %v2378_v6, %v4876_v18  ;;  %v2443_v33 = vmax.f32 %v2411_v52, 0.0 }
 0x5d3   : > { %v2441_v63 = vmax.f32 %v2409_v43, 0.0  ;;  %v2410_v20 = vadd.f32 %v2370_v54, %v4877_v14 }
 0x5d4   : > { %v2444_v40 = vmax.f32 %v2412_v53, 0.0  ;;  %v2482_v35 = vmul.f32 %v4529_v21, %v2443_v33 }
 0x5d5   : > { %v2442_v36 = vmax.f32 %v2410_v20, 0.0  ;;  %v2480_v58 = vmul.f32 %v4529_v21, %v2441_v63 }
 0x5d6   : > { %v2483_v16 = vmul.f32 %v4529_v21, %v2444_v40 }
 0x5d7   : > { %2540 = vadd.xlane.f32.xlu0 %v2480_v58  ;;  %v2481_v12 = vmul.f32 %v4529_v21, %v2442_v36 }
 0x5d9   : > { %2542 = vadd.xlane.f32.xlu1 %v2481_v12 }
 0x5db   : > { %2544 = vadd.xlane.f32.xlu0 %v2482_v35 }
 0x5dd   : > { %2546 = vadd.xlane.f32.xlu1 %v2483_v16 }
 0x5f3   : > { %v2489_v3 = vpop.xlane.xlu1 %2488 }
 0x5f4   : > { %v2557_v22 = vadd.f32 %v4654_v11, %v2489_v3  ;;  %v2485_v23 = vpop.xlane.xlu0 %2484 }
 0x5f5   : > { %v2555_v21 = vadd.f32 %v4654_v11, %v2485_v23 }
 0x5f6   : > { %2590 = vst.msk [vmem:[%s4659_s27 + $0x10] sm:$0xff] %vm2587_vm2, %v2557_v22 }
 0x5f7   : > { %2588 = vst.msk [vmem:[%s4659_s27] sm:$0xff] %vm2587_vm2, %v2555_v21  ;;  %v2491_v29 = vpop.xlane.xlu1 %2490 }
 0x5f8   : > { %v2558_v45 = vadd.f32 %v4654_v11, %v2491_v29  ;;  %v2487_v39 = vpop.xlane.xlu0 %2486 }
 0x5f9   : > { %v2556_v57 = vadd.f32 %v4654_v11, %v2487_v39 }
 0x5fa   : > { %2591 = vst.msk [vmem:[%s4659_s27 + $0x18] sm:$0xff] %vm2587_vm2, %v2558_v45 }
 0x5fb   : > { %2589 = vst.msk [vmem:[%s4659_s27 + $0x8] sm:$0xff] %vm2587_vm2, %v2556_v57 }
 0x603   : > { %v2497_v13 = vpop.xlane.xlu0 %2496 }
 0x604   : > { %v2561_v1 = vadd.f32 %v4654_v11, %v2497_v13 }
 0x605   : > { %v2499_v61 = vpop.xlane.xlu1 %2498 }
 0x606   : > { %2594 = vst.msk [vmem:[%s4659_s27 + $0x30] sm:$0xff] %vm2587_vm2, %v2561_v1  ;;  %v2562_v26 = vadd.f32 %v4654_v11, %v2499_v61 }
 0x607   : > { %v2493_v5 = vpop.xlane.xlu0 %2492 }
 0x608   : > { %2595 = vst.msk [vmem:[%s4659_s27 + $0x38] sm:$0xff] %vm2587_vm2, %v2562_v26  ;;  %v2559_v51 = vadd.f32 %v4654_v11, %v2493_v5 }
 0x609   : > { %v2495_v4 = vpop.xlane.xlu1 %2494 }
 0x60a   : > { %2592 = vst.msk [vmem:[%s4659_s27 + $0x20] sm:$0xff] %vm2587_vm2, %v2559_v51  ;;  %v2560_v28 = vadd.f32 %v4654_v11, %v2495_v4 }
 0x60c   : > { %2593 = vst.msk [vmem:[%s4659_s27 + $0x28] sm:$0xff] %vm2587_vm2, %v2560_v28 }
 0x613   : > { %v2505_v2 = vpop.xlane.xlu0 %2504 }
 0x614   : > { %v2565_v30 = vadd.f32 %v4654_v11, %v2505_v2 }
 0x615   : > { %v2507_v49 = vpop.xlane.xlu1 %2506 }
 0x616   : > { %2598 = vst.msk [vmem:[%s4659_s27 + $0x50] sm:$0xff] %vm2587_vm2, %v2565_v30  ;;  %v2566_v34 = vadd.f32 %v4654_v11, %v2507_v49 }
 0x617   : > { %v2501_v59 = vpop.xlane.xlu0 %2500 }
 0x618   : > { %2599 = vst.msk [vmem:[%s4659_s27 + $0x58] sm:$0xff] %vm2587_vm2, %v2566_v34  ;;  %v2563_v24 = vadd.f32 %v4654_v11, %v2501_v59 }
 0x619   : > { %v2503_v60 = vpop.xlane.xlu1 %2502 }
 0x61a   : > { %2596 = vst.msk [vmem:[%s4659_s27 + $0x40] sm:$0xff] %vm2587_vm2, %v2563_v24  ;;  %v2564_v47 = vadd.f32 %v4654_v11, %v2503_v60 }
 0x61c   : > { %2597 = vst.msk [vmem:[%s4659_s27 + $0x48] sm:$0xff] %vm2587_vm2, %v2564_v47 }
 0x623   : > { %v2513_v32 = vpop.xlane.xlu0 %2512 }
 0x624   : > { %v2569_v9 = vadd.f32 %v4654_v11, %v2513_v32 }
 0x625   : > { %v2515_v55 = vpop.xlane.xlu1 %2514 }
 0x626   : > { %2602 = vst.msk [vmem:[%s4659_s27 + $0x70] sm:$0xff] %vm2587_vm2, %v2569_v9  ;;  %v2570_v56 = vadd.f32 %v4654_v11, %v2515_v55 }
 0x627   : > { %v2509_v27 = vpop.xlane.xlu0 %2508 }
 0x628   : > { %2603 = vst.msk [vmem:[%s4659_s27 + $0x78] sm:$0xff] %vm2587_vm2, %v2570_v56  ;;  %v2567_v0 = vadd.f32 %v4654_v11, %v2509_v27 }
 0x629   : > { %v2511_v15 = vpop.xlane.xlu1 %2510 }
 0x62a   : > { %2600 = vst.msk [vmem:[%s4659_s27 + $0x60] sm:$0xff] %vm2587_vm2, %v2567_v0  ;;  %v2568_v38 = vadd.f32 %v4654_v11, %v2511_v15 }
 0x62c   : > { %2601 = vst.msk [vmem:[%s4659_s27 + $0x68] sm:$0xff] %vm2587_vm2, %v2568_v38 }
 0x633   : > { %v2521_v37 = vpop.xlane.xlu0 %2520 }
 0x634   : > { %v2573_v25 = vadd.f32 %v4654_v11, %v2521_v37 }
 0x635   : > { %v2523_v62 = vpop.xlane.xlu1 %2522 }
 0x636   : > { %2606 = vst.msk [vmem:[%s4659_s27 + $0x90] sm:$0xff] %vm2587_vm2, %v2573_v25  ;;  %v2574_v41 = vadd.f32 %v4654_v11, %v2523_v62 }
 0x637   : > { %v2517_v8 = vpop.xlane.xlu0 %2516 }
 0x638   : > { %2607 = vst.msk [vmem:[%s4659_s27 + $0x98] sm:$0xff] %vm2587_vm2, %v2574_v41  ;;  %v2571_v7 = vadd.f32 %v4654_v11, %v2517_v8 }
 0x639   : > { %v2519_v31 = vpop.xlane.xlu1 %2518 }
 0x63a   : > { %2604 = vst.msk [vmem:[%s4659_s27 + $0x80] sm:$0xff] %vm2587_vm2, %v2571_v7  ;;  %v2572_v50 = vadd.f32 %v4654_v11, %v2519_v31 }
 0x63c   : > { %2605 = vst.msk [vmem:[%s4659_s27 + $0x88] sm:$0xff] %vm2587_vm2, %v2572_v50 }
 0x643   : > { %v2529_v10 = vpop.xlane.xlu0 %2528 }
 0x644   : > { %v2577_v17 = vadd.f32 %v4654_v11, %v2529_v10 }
 0x645   : > { %v2531_v46 = vpop.xlane.xlu1 %2530 }
 0x646   : > { %2610 = vst.msk [vmem:[%s4659_s27 + $0xb0] sm:$0xff] %vm2587_vm2, %v2577_v17  ;;  %v2578_v42 = vadd.f32 %v4654_v11, %v2531_v46 }
 0x647   : > { %v2525_v6 = vpop.xlane.xlu0 %2524 }
 0x648   : > { %2611 = vst.msk [vmem:[%s4659_s27 + $0xb8] sm:$0xff] %vm2587_vm2, %v2578_v42  ;;  %v2575_v44 = vadd.f32 %v4654_v11, %v2525_v6 }
 0x649   : > { %v2527_v19 = vpop.xlane.xlu1 %2526 }
 0x64a   : > { %2608 = vst.msk [vmem:[%s4659_s27 + $0xa0] sm:$0xff] %vm2587_vm2, %v2575_v44  ;;  %v2576_v52 = vadd.f32 %v4654_v11, %v2527_v19 }
 0x64c   : > { %2609 = vst.msk [vmem:[%s4659_s27 + $0xa8] sm:$0xff] %vm2587_vm2, %v2576_v52 }
 0x653   : > { %v2537_v48 = vpop.xlane.xlu0 %2536 }
 0x654   : > { %v2581_v43 = vadd.f32 %v4654_v11, %v2537_v48 }
 0x655   : > { %v2539_v54 = vpop.xlane.xlu1 %2538 }
 0x656   : > { %2614 = vst.msk [vmem:[%s4659_s27 + $0xd0] sm:$0xff] %vm2587_vm2, %v2581_v43  ;;  %v2582_v63 = vadd.f32 %v4654_v11, %v2539_v54 }
 0x657   : > { %v2533_v18 = vpop.xlane.xlu0 %2532 }
 0x658   : > { %2615 = vst.msk [vmem:[%s4659_s27 + $0xd8] sm:$0xff] %vm2587_vm2, %v2582_v63  ;;  %v2579_v53 = vadd.f32 %v4654_v11, %v2533_v18 }
 0x659   : > { %v2535_v14 = vpop.xlane.xlu1 %2534 }
 0x65a   : > { %2612 = vst.msk [vmem:[%s4659_s27 + $0xc0] sm:$0xff] %vm2587_vm2, %v2579_v53  ;;  %v2580_v20 = vadd.f32 %v4654_v11, %v2535_v14 }
 0x65c   : > { %2613 = vst.msk [vmem:[%s4659_s27 + $0xc8] sm:$0xff] %vm2587_vm2, %v2580_v20 }
 0x664   : > { %v2541_v33 = vpop.xlane.xlu0 %2540 }
 0x665   : > { %v2583_v36 = vadd.f32 %v4654_v11, %v2541_v33 }
 0x666   : > { %v2543_v58 = vpop.xlane.xlu1 %2542 }
 0x667   : > { %2616 = vst.msk [vmem:[%s4659_s27 + $0xe0] sm:$0xff] %vm2587_vm2, %v2583_v36  ;;  %v2584_v40 = vadd.f32 %v4654_v11, %v2543_v58 }
 0x668   : > { %v2545_v12 = vpop.xlane.xlu0 %2544 }
 0x669   : > { %2617 = vst.msk [vmem:[%s4659_s27 + $0xe8] sm:$0xff] %vm2587_vm2, %v2584_v40  ;;  %v2585_v35 = vadd.f32 %v4654_v11, %v2545_v12 }
 0x66a   : > { %v2547_v16 = vpop.xlane.xlu1 %2546 }
 0x66b   : > { %2618 = vst.msk [vmem:[%s4659_s27 + $0xf0] sm:$0xff] %vm2587_vm2, %v2585_v35  ;;  %v2586_v3 = vadd.f32 %v4654_v11, %v2547_v16 }
 0x66d   : > { %2619 = vst.msk [vmem:[%s4659_s27 + $0xf8] sm:$0xff] %vm2587_vm2, %v2586_v3 }
 0x66e PF: > { %s24_s23 = sadd.s32 1, %s3270_s23  }
 0x66f   : > { %p21_p4 = scmp.ge.s32.totalorder %s24_s23, 4  }
 0x671   :  { %23 = sbr.rel (!%p21_p4) target bundleno = 3 (0x3), region = 102 }

</bundles_post_ra>
